<compile_context>
chip_gen: v7x
topology: tpu7x:2x2x1
jax: 0.10.0
libtpu: 0.0.40
codegen_flags: <defaults>
</compile_context>

<pallas_src>
import functools

import jax
import jax.numpy as jnp
from jax.experimental import pallas as pl
from jax.experimental.pallas import tpu as pltpu


# ----------------------------------------------------------------------------
# Pallas kernel: direct 3x3 conv (pad=1, stride=1) on one row tile of one image
# ----------------------------------------------------------------------------
def _conv3x3_kernel(w_ref, b_ref, x_ref, o_ref, *, TH, W, Cin, Cout, KH, KW):
    # w_ref: SMEM (Cout*Cin*KH*KW,) f32   flattened OIHW weights
    # b_ref: SMEM (Cout,)           f32   bias
    # x_ref: VMEM (1, Cin, Hp, Wp)  f32   spatially padded image (resident per n)
    # o_ref: VMEM (1, Cout, TH, W)  f32   output row tile
    h = pl.program_id(1)
    row0 = pl.multiple_of(h * TH, TH)

    # Initialize accumulators with the bias (one broadcast instead of a
    # trailing add per channel).
    accs = [jnp.full((TH, W), b_ref[co], jnp.float32) for co in range(Cout)]

    for ci in range(Cin):
        # Row window for this tile plus its (KH-1)-row halo: (TH+KH-1, Wp).
        xci = x_ref[0, ci, pl.ds(row0, TH + KH - 1), :]
        for ki in range(KH):
            xrow = xci[ki:ki + TH, :]                 # sublane-shifted tap rows
            for kj in range(KW):
                tap = xrow[:, kj:kj + W]              # lane-shifted tap (TH, W)
                # One tap feeds all output channels (tap built once, reused).
                for co in range(Cout):
                    w = w_ref[((co * Cin + ci) * KH + ki) * KW + kj]
                    accs[co] = accs[co] + w * tap

    for co in range(Cout):
        o_ref[0, co, :, :] = accs[co]


def _pick_row_tile(H, W, Cin, Cout, pad, vmem_budget_bytes=20 << 20):
    """Largest multiple-of-8 divisor of H whose tiles fit the VMEM budget.

    The padded input image stays resident per batch index, so bigger row
    tiles only grow the output tile + in-kernel temporaries.  Falls back to
    the full height when H has no multiple-of-8 divisor.
    """
    Hp, Wp = H + 2 * pad, W + 2 * pad
    in_resident = 2 * Cin * Hp * Wp * 4            # double-buffered input image

    def fits(th):
        out_tile = 2 * Cout * th * W * 4           # double-buffered output tile
        temps = (Cout + 2) * th * W * 4            # accumulators + tap temporaries
        return in_resident + out_tile + temps <= vmem_budget_bytes

    best = 0
    for th in range(8, H + 1, 8):
        if H % th == 0 and fits(th):
            best = th
    return best if best > 0 else H


@jax.jit
def conv3x3_pallas(x, weight, bias):
    """x: (N, Cin, H, W) f32; weight: (Cout, Cin, KH, KW) OIHW; bias: (Cout,)."""
    N, Cin, H, W = x.shape
    Cout, _, KH, KW = weight.shape
    pad = (KH - 1) // 2

    xp = jnp.pad(x.astype(jnp.float32),
                 ((0, 0), (0, 0), (pad, pad), (pad, pad)))
    Hp, Wp = H + 2 * pad, W + 2 * pad
    TH = _pick_row_tile(H, W, Cin, Cout, pad)

    kernel = functools.partial(
        _conv3x3_kernel, TH=TH, W=W, Cin=Cin, Cout=Cout, KH=KH, KW=KW)

    flops = 2 * N * H * W * Cout * Cin * KH * KW
    bytes_accessed = 4 * (N * Cin * Hp * Wp + N * Cout * H * W
                          + weight.size + bias.size)

    return pl.pallas_call(
        kernel,
        out_shape=jax.ShapeDtypeStruct((N, Cout, H, W), jnp.float32),
        grid_spec=pltpu.PrefetchScalarGridSpec(
            num_scalar_prefetch=0,
            grid=(N, H // TH),
            in_specs=[
                # Small scalar operands -> SMEM, read as scalars in the kernel.
                pl.BlockSpec(memory_space=pltpu.MemorySpace.SMEM),   # weights
                pl.BlockSpec(memory_space=pltpu.MemorySpace.SMEM),   # bias
                # Full padded image per batch index; resident across row tiles
                # (block index is constant in h, so it is DMA'd once per n).
                pl.BlockSpec((1, Cin, Hp, Wp), lambda n, h: (n, 0, 0, 0)),
            ],
            out_specs=pl.BlockSpec((1, Cout, TH, W), lambda n, h: (n, 0, h, 0)),
        ),
        compiler_params=pltpu.CompilerParams(
            dimension_semantics=("parallel", "parallel"),
        ),
        cost_estimate=pl.CostEstimate(
            flops=flops, transcendentals=0, bytes_accessed=bytes_accessed),
    )(
        weight.reshape(-1).astype(jnp.float32),
        bias.astype(jnp.float32),
        xp,
    )


# ----------------------------------------------------------------------------
# TRTWrapper equivalent: dict-of-named-inputs -> dict-of-named-outputs
# ----------------------------------------------------------------------------
class TRTWrapper:
    """Mimics the TensorRT engine wrapper: forward(dict) -> dict.

    The engine content (a 3->3 channel 3x3 conv, pad 1, stride 1) is
    synthesized deterministically in-script instead of being deserialized
    from 'model.engine'.
    """

    def __init__(self, output_names=("output",), cin=3, cout=3, ksize=3, pad=1):
        self._input_names = ["input"]
        self._output_names = list(output_names)
        self.cin, self.cout, self.ksize, self.pad = cin, cout, ksize, pad

        # Deterministic "engine weights" (OIHW) and bias.
        kw = jax.random.PRNGKey(1)
        kb = jax.random.PRNGKey(2)
        self.weight = jax.random.normal(
            kw, (cout, cin, ksize, ksize), dtype=jnp.float32) * 0.1
        self.bias = jax.random.normal(kb, (cout,), dtype=jnp.float32) * 0.1

    def __call__(self, inputs):
        assert self._input_names is not None
        assert self._output_names is not None
        x = inputs["input"]                       # (N, Cin, H, W), NCHW
        assert x.ndim == 4 and x.shape[1] == self.cin
        x = x.astype(jnp.float32)

        out = conv3x3_pallas(x, self.weight, self.bias)   # (N, Cout, H, W) f32

        outputs = {}
        for name in self._output_names:
            outputs[name] = out
        return outputs


# ----------------------------------------------------------------------------
if __name__ == "__main__":
    # Small shapes consistent with the engine profile (1,3,224,224), scaled down.
    N, C, H, W = 2, 3, 16, 16
    x = jax.random.normal(jax.random.PRNGKey(0), (N, C, H, W), dtype=jnp.float32)

    model = TRTWrapper(output_names=["output"])
    outputs = model(dict(input=x))
    out = outputs["output"]
    jax.block_until_ready(out)

    # Sanity check against XLA's conv (reference semantics of the "engine").
    ref = jax.lax.conv_general_dilated(
        x, model.weight, window_strides=(1, 1), padding=[(1, 1), (1, 1)],
        dimension_numbers=("NCHW", "OIHW", "NCHW"),
    ) + model.bias.reshape(1, -1, 1, 1)
    assert out.shape == (N, 3, H, W)
    assert out.dtype == jnp.float32
    assert jnp.max(jnp.abs(out - ref)) < 1e-4

    print("KERNEL_OK")
</pallas_src>

<mosaic_0001>
module attributes {stable_mosaic.version = 11 : i64} {
  func.func @_conv3x3_kernel(%arg0: i32, %arg1: i32, %arg2: memref<81xf32, #tpu.memory_space<smem>>, %arg3: memref<3xf32, #tpu.memory_space<smem>>, %arg4: memref<1x3x18x18xf32, #tpu.memory_space<vmem>>, %arg5: memref<1x3x16x16xf32, #tpu.memory_space<vmem>>) attributes {dimension_semantics = [#tpu.dimension_semantics<parallel>, #tpu.dimension_semantics<parallel>], iteration_bounds = array<i64: 2, 1>, scalar_prefetch = 0 : i64, scratch_operands = 0 : i64, tpu.core_type = #tpu.core_type<tc>, window_params = [{transform_indices = @transform_0, window_bounds = array<i64: 81>}, {transform_indices = @transform_1, window_bounds = array<i64: 3>}, {transform_indices = @transform_2, window_bounds = array<i64: 1, 3, 18, 18>}, {transform_indices = @transform_3, window_bounds = array<i64: 1, 3, 16, 16>}]} {
    %c16_i32 = arith.constant 16 : i32
    %0 = arith.muli %arg1, %c16_i32 : i32
    %1 = tpu.assume_multiple %0, 16 : i32
    %c0 = arith.constant 0 : index
    %2 = memref.load %arg3[%c0] : memref<3xf32, #tpu.memory_space<smem>>
    %3 = vector.broadcast %2 : f32 to vector<16x16xf32>
    %c1 = arith.constant 1 : index
    %4 = memref.load %arg3[%c1] : memref<3xf32, #tpu.memory_space<smem>>
    %5 = vector.broadcast %4 : f32 to vector<16x16xf32>
    %c2 = arith.constant 2 : index
    %6 = memref.load %arg3[%c2] : memref<3xf32, #tpu.memory_space<smem>>
    %7 = vector.broadcast %6 : f32 to vector<16x16xf32>
    %c0_0 = arith.constant 0 : index
    %c0_1 = arith.constant 0 : index
    %8 = arith.index_cast %1 : i32 to index
    %c0_2 = arith.constant 0 : index
    %9 = vector.load %arg4[%c0_0, %c0_1, %8, %c0_2] : memref<1x3x18x18xf32, #tpu.memory_space<vmem>>, vector<1x1x18x18xf32>
    %10 = vector.shape_cast %9 : vector<1x1x18x18xf32> to vector<18x18xf32>
    %11 = vector.extract_strided_slice %10 {offsets = [0, 0], sizes = [16, 18], strides = [1, 1]} : vector<18x18xf32> to vector<16x18xf32>
    %12 = vector.extract_strided_slice %11 {offsets = [0, 0], sizes = [16, 16], strides = [1, 1]} : vector<16x18xf32> to vector<16x16xf32>
    %c0_3 = arith.constant 0 : index
    %13 = memref.load %arg2[%c0_3] : memref<81xf32, #tpu.memory_space<smem>>
    %14 = vector.broadcast %13 : f32 to vector<16x16xf32>
    %15 = arith.mulf %14, %12 : vector<16x16xf32>
    %16 = arith.addf %3, %15 : vector<16x16xf32>
    %c27 = arith.constant 27 : index
    %17 = memref.load %arg2[%c27] : memref<81xf32, #tpu.memory_space<smem>>
    %18 = vector.broadcast %17 : f32 to vector<16x16xf32>
    %19 = arith.mulf %18, %12 : vector<16x16xf32>
    %20 = arith.addf %5, %19 : vector<16x16xf32>
    %c54 = arith.constant 54 : index
    %21 = memref.load %arg2[%c54] : memref<81xf32, #tpu.memory_space<smem>>
    %22 = vector.broadcast %21 : f32 to vector<16x16xf32>
    %23 = arith.mulf %22, %12 : vector<16x16xf32>
    %24 = arith.addf %7, %23 : vector<16x16xf32>
    %25 = vector.extract_strided_slice %11 {offsets = [0, 1], sizes = [16, 16], strides = [1, 1]} : vector<16x18xf32> to vector<16x16xf32>
    %c1_4 = arith.constant 1 : index
    %26 = memref.load %arg2[%c1_4] : memref<81xf32, #tpu.memory_space<smem>>
    %27 = vector.broadcast %26 : f32 to vector<16x16xf32>
    %28 = arith.mulf %27, %25 : vector<16x16xf32>
    %29 = arith.addf %16, %28 : vector<16x16xf32>
    %c28 = arith.constant 28 : index
    %30 = memref.load %arg2[%c28] : memref<81xf32, #tpu.memory_space<smem>>
    %31 = vector.broadcast %30 : f32 to vector<16x16xf32>
    %32 = arith.mulf %31, %25 : vector<16x16xf32>
    %33 = arith.addf %20, %32 : vector<16x16xf32>
    %c55 = arith.constant 55 : index
    %34 = memref.load %arg2[%c55] : memref<81xf32, #tpu.memory_space<smem>>
    %35 = vector.broadcast %34 : f32 to vector<16x16xf32>
    %36 = arith.mulf %35, %25 : vector<16x16xf32>
    %37 = arith.addf %24, %36 : vector<16x16xf32>
    %38 = vector.extract_strided_slice %11 {offsets = [0, 2], sizes = [16, 16], strides = [1, 1]} : vector<16x18xf32> to vector<16x16xf32>
    %c2_5 = arith.constant 2 : index
    %39 = memref.load %arg2[%c2_5] : memref<81xf32, #tpu.memory_space<smem>>
    %40 = vector.broadcast %39 : f32 to vector<16x16xf32>
    %41 = arith.mulf %40, %38 : vector<16x16xf32>
    %42 = arith.addf %29, %41 : vector<16x16xf32>
    %c29 = arith.constant 29 : index
    %43 = memref.load %arg2[%c29] : memref<81xf32, #tpu.memory_space<smem>>
    %44 = vector.broadcast %43 : f32 to vector<16x16xf32>
    %45 = arith.mulf %44, %38 : vector<16x16xf32>
    %46 = arith.addf %33, %45 : vector<16x16xf32>
    %c56 = arith.constant 56 : index
    %47 = memref.load %arg2[%c56] : memref<81xf32, #tpu.memory_space<smem>>
    %48 = vector.broadcast %47 : f32 to vector<16x16xf32>
    %49 = arith.mulf %48, %38 : vector<16x16xf32>
    %50 = arith.addf %37, %49 : vector<16x16xf32>
    %51 = vector.extract_strided_slice %10 {offsets = [1, 0], sizes = [16, 18], strides = [1, 1]} : vector<18x18xf32> to vector<16x18xf32>
    %52 = vector.extract_strided_slice %51 {offsets = [0, 0], sizes = [16, 16], strides = [1, 1]} : vector<16x18xf32> to vector<16x16xf32>
    %c3 = arith.constant 3 : index
    %53 = memref.load %arg2[%c3] : memref<81xf32, #tpu.memory_space<smem>>
    %54 = vector.broadcast %53 : f32 to vector<16x16xf32>
    %55 = arith.mulf %54, %52 : vector<16x16xf32>
    %56 = arith.addf %42, %55 : vector<16x16xf32>
    %c30 = arith.constant 30 : index
    %57 = memref.load %arg2[%c30] : memref<81xf32, #tpu.memory_space<smem>>
    %58 = vector.broadcast %57 : f32 to vector<16x16xf32>
    %59 = arith.mulf %58, %52 : vector<16x16xf32>
    %60 = arith.addf %46, %59 : vector<16x16xf32>
    %c57 = arith.constant 57 : index
    %61 = memref.load %arg2[%c57] : memref<81xf32, #tpu.memory_space<smem>>
    %62 = vector.broadcast %61 : f32 to vector<16x16xf32>
    %63 = arith.mulf %62, %52 : vector<16x16xf32>
    %64 = arith.addf %50, %63 : vector<16x16xf32>
    %65 = vector.extract_strided_slice %51 {offsets = [0, 1], sizes = [16, 16], strides = [1, 1]} : vector<16x18xf32> to vector<16x16xf32>
    %c4 = arith.constant 4 : index
    %66 = memref.load %arg2[%c4] : memref<81xf32, #tpu.memory_space<smem>>
    %67 = vector.broadcast %66 : f32 to vector<16x16xf32>
    %68 = arith.mulf %67, %65 : vector<16x16xf32>
    %69 = arith.addf %56, %68 : vector<16x16xf32>
    %c31 = arith.constant 31 : index
    %70 = memref.load %arg2[%c31] : memref<81xf32, #tpu.memory_space<smem>>
    %71 = vector.broadcast %70 : f32 to vector<16x16xf32>
    %72 = arith.mulf %71, %65 : vector<16x16xf32>
    %73 = arith.addf %60, %72 : vector<16x16xf32>
    %c58 = arith.constant 58 : index
    %74 = memref.load %arg2[%c58] : memref<81xf32, #tpu.memory_space<smem>>
    %75 = vector.broadcast %74 : f32 to vector<16x16xf32>
    %76 = arith.mulf %75, %65 : vector<16x16xf32>
    %77 = arith.addf %64, %76 : vector<16x16xf32>
    %78 = vector.extract_strided_slice %51 {offsets = [0, 2], sizes = [16, 16], strides = [1, 1]} : vector<16x18xf32> to vector<16x16xf32>
    %c5 = arith.constant 5 : index
    %79 = memref.load %arg2[%c5] : memref<81xf32, #tpu.memory_space<smem>>
    %80 = vector.broadcast %79 : f32 to vector<16x16xf32>
    %81 = arith.mulf %80, %78 : vector<16x16xf32>
    %82 = arith.addf %69, %81 : vector<16x16xf32>
    %c32 = arith.constant 32 : index
    %83 = memref.load %arg2[%c32] : memref<81xf32, #tpu.memory_space<smem>>
    %84 = vector.broadcast %83 : f32 to vector<16x16xf32>
    %85 = arith.mulf %84, %78 : vector<16x16xf32>
    %86 = arith.addf %73, %85 : vector<16x16xf32>
    %c59 = arith.constant 59 : index
    %87 = memref.load %arg2[%c59] : memref<81xf32, #tpu.memory_space<smem>>
    %88 = vector.broadcast %87 : f32 to vector<16x16xf32>
    %89 = arith.mulf %88, %78 : vector<16x16xf32>
    %90 = arith.addf %77, %89 : vector<16x16xf32>
    %91 = vector.extract_strided_slice %10 {offsets = [2, 0], sizes = [16, 18], strides = [1, 1]} : vector<18x18xf32> to vector<16x18xf32>
    %92 = vector.extract_strided_slice %91 {offsets = [0, 0], sizes = [16, 16], strides = [1, 1]} : vector<16x18xf32> to vector<16x16xf32>
    %c6 = arith.constant 6 : index
    %93 = memref.load %arg2[%c6] : memref<81xf32, #tpu.memory_space<smem>>
    %94 = vector.broadcast %93 : f32 to vector<16x16xf32>
    %95 = arith.mulf %94, %92 : vector<16x16xf32>
    %96 = arith.addf %82, %95 : vector<16x16xf32>
    %c33 = arith.constant 33 : index
    %97 = memref.load %arg2[%c33] : memref<81xf32, #tpu.memory_space<smem>>
    %98 = vector.broadcast %97 : f32 to vector<16x16xf32>
    %99 = arith.mulf %98, %92 : vector<16x16xf32>
    %100 = arith.addf %86, %99 : vector<16x16xf32>
    %c60 = arith.constant 60 : index
    %101 = memref.load %arg2[%c60] : memref<81xf32, #tpu.memory_space<smem>>
    %102 = vector.broadcast %101 : f32 to vector<16x16xf32>
    %103 = arith.mulf %102, %92 : vector<16x16xf32>
    %104 = arith.addf %90, %103 : vector<16x16xf32>
    %105 = vector.extract_strided_slice %91 {offsets = [0, 1], sizes = [16, 16], strides = [1, 1]} : vector<16x18xf32> to vector<16x16xf32>
    %c7 = arith.constant 7 : index
    %106 = memref.load %arg2[%c7] : memref<81xf32, #tpu.memory_space<smem>>
    %107 = vector.broadcast %106 : f32 to vector<16x16xf32>
    %108 = arith.mulf %107, %105 : vector<16x16xf32>
    %109 = arith.addf %96, %108 : vector<16x16xf32>
    %c34 = arith.constant 34 : index
    %110 = memref.load %arg2[%c34] : memref<81xf32, #tpu.memory_space<smem>>
    %111 = vector.broadcast %110 : f32 to vector<16x16xf32>
    %112 = arith.mulf %111, %105 : vector<16x16xf32>
    %113 = arith.addf %100, %112 : vector<16x16xf32>
    %c61 = arith.constant 61 : index
    %114 = memref.load %arg2[%c61] : memref<81xf32, #tpu.memory_space<smem>>
    %115 = vector.broadcast %114 : f32 to vector<16x16xf32>
    %116 = arith.mulf %115, %105 : vector<16x16xf32>
    %117 = arith.addf %104, %116 : vector<16x16xf32>
    %118 = vector.extract_strided_slice %91 {offsets = [0, 2], sizes = [16, 16], strides = [1, 1]} : vector<16x18xf32> to vector<16x16xf32>
    %c8 = arith.constant 8 : index
    %119 = memref.load %arg2[%c8] : memref<81xf32, #tpu.memory_space<smem>>
    %120 = vector.broadcast %119 : f32 to vector<16x16xf32>
    %121 = arith.mulf %120, %118 : vector<16x16xf32>
    %122 = arith.addf %109, %121 : vector<16x16xf32>
    %c35 = arith.constant 35 : index
    %123 = memref.load %arg2[%c35] : memref<81xf32, #tpu.memory_space<smem>>
    %124 = vector.broadcast %123 : f32 to vector<16x16xf32>
    %125 = arith.mulf %124, %118 : vector<16x16xf32>
    %126 = arith.addf %113, %125 : vector<16x16xf32>
    %c62 = arith.constant 62 : index
    %127 = memref.load %arg2[%c62] : memref<81xf32, #tpu.memory_space<smem>>
    %128 = vector.broadcast %127 : f32 to vector<16x16xf32>
    %129 = arith.mulf %128, %118 : vector<16x16xf32>
    %130 = arith.addf %117, %129 : vector<16x16xf32>
    %c0_6 = arith.constant 0 : index
    %c1_7 = arith.constant 1 : index
    %131 = arith.index_cast %1 : i32 to index
    %c0_8 = arith.constant 0 : index
    %132 = vector.load %arg4[%c0_6, %c1_7, %131, %c0_8] : memref<1x3x18x18xf32, #tpu.memory_space<vmem>>, vector<1x1x18x18xf32>
    %133 = vector.shape_cast %132 : vector<1x1x18x18xf32> to vector<18x18xf32>
    %134 = vector.extract_strided_slice %133 {offsets = [0, 0], sizes = [16, 18], strides = [1, 1]} : vector<18x18xf32> to vector<16x18xf32>
    %135 = vector.extract_strided_slice %134 {offsets = [0, 0], sizes = [16, 16], strides = [1, 1]} : vector<16x18xf32> to vector<16x16xf32>
    %c9 = arith.constant 9 : index
    %136 = memref.load %arg2[%c9] : memref<81xf32, #tpu.memory_space<smem>>
    %137 = vector.broadcast %136 : f32 to vector<16x16xf32>
    %138 = arith.mulf %137, %135 : vector<16x16xf32>
    %139 = arith.addf %122, %138 : vector<16x16xf32>
    %c36 = arith.constant 36 : index
    %140 = memref.load %arg2[%c36] : memref<81xf32, #tpu.memory_space<smem>>
    %141 = vector.broadcast %140 : f32 to vector<16x16xf32>
    %142 = arith.mulf %141, %135 : vector<16x16xf32>
    %143 = arith.addf %126, %142 : vector<16x16xf32>
    %c63 = arith.constant 63 : index
    %144 = memref.load %arg2[%c63] : memref<81xf32, #tpu.memory_space<smem>>
    %145 = vector.broadcast %144 : f32 to vector<16x16xf32>
    %146 = arith.mulf %145, %135 : vector<16x16xf32>
    %147 = arith.addf %130, %146 : vector<16x16xf32>
    %148 = vector.extract_strided_slice %134 {offsets = [0, 1], sizes = [16, 16], strides = [1, 1]} : vector<16x18xf32> to vector<16x16xf32>
    %c10 = arith.constant 10 : index
    %149 = memref.load %arg2[%c10] : memref<81xf32, #tpu.memory_space<smem>>
    %150 = vector.broadcast %149 : f32 to vector<16x16xf32>
    %151 = arith.mulf %150, %148 : vector<16x16xf32>
    %152 = arith.addf %139, %151 : vector<16x16xf32>
    %c37 = arith.constant 37 : index
    %153 = memref.load %arg2[%c37] : memref<81xf32, #tpu.memory_space<smem>>
    %154 = vector.broadcast %153 : f32 to vector<16x16xf32>
    %155 = arith.mulf %154, %148 : vector<16x16xf32>
    %156 = arith.addf %143, %155 : vector<16x16xf32>
    %c64 = arith.constant 64 : index
    %157 = memref.load %arg2[%c64] : memref<81xf32, #tpu.memory_space<smem>>
    %158 = vector.broadcast %157 : f32 to vector<16x16xf32>
    %159 = arith.mulf %158, %148 : vector<16x16xf32>
    %160 = arith.addf %147, %159 : vector<16x16xf32>
    %161 = vector.extract_strided_slice %134 {offsets = [0, 2], sizes = [16, 16], strides = [1, 1]} : vector<16x18xf32> to vector<16x16xf32>
    %c11 = arith.constant 11 : index
    %162 = memref.load %arg2[%c11] : memref<81xf32, #tpu.memory_space<smem>>
    %163 = vector.broadcast %162 : f32 to vector<16x16xf32>
    %164 = arith.mulf %163, %161 : vector<16x16xf32>
    %165 = arith.addf %152, %164 : vector<16x16xf32>
    %c38 = arith.constant 38 : index
    %166 = memref.load %arg2[%c38] : memref<81xf32, #tpu.memory_space<smem>>
    %167 = vector.broadcast %166 : f32 to vector<16x16xf32>
    %168 = arith.mulf %167, %161 : vector<16x16xf32>
    %169 = arith.addf %156, %168 : vector<16x16xf32>
    %c65 = arith.constant 65 : index
    %170 = memref.load %arg2[%c65] : memref<81xf32, #tpu.memory_space<smem>>
    %171 = vector.broadcast %170 : f32 to vector<16x16xf32>
    %172 = arith.mulf %171, %161 : vector<16x16xf32>
    %173 = arith.addf %160, %172 : vector<16x16xf32>
    %174 = vector.extract_strided_slice %133 {offsets = [1, 0], sizes = [16, 18], strides = [1, 1]} : vector<18x18xf32> to vector<16x18xf32>
    %175 = vector.extract_strided_slice %174 {offsets = [0, 0], sizes = [16, 16], strides = [1, 1]} : vector<16x18xf32> to vector<16x16xf32>
    %c12 = arith.constant 12 : index
    %176 = memref.load %arg2[%c12] : memref<81xf32, #tpu.memory_space<smem>>
    %177 = vector.broadcast %176 : f32 to vector<16x16xf32>
    %178 = arith.mulf %177, %175 : vector<16x16xf32>
    %179 = arith.addf %165, %178 : vector<16x16xf32>
    %c39 = arith.constant 39 : index
    %180 = memref.load %arg2[%c39] : memref<81xf32, #tpu.memory_space<smem>>
    %181 = vector.broadcast %180 : f32 to vector<16x16xf32>
    %182 = arith.mulf %181, %175 : vector<16x16xf32>
    %183 = arith.addf %169, %182 : vector<16x16xf32>
    %c66 = arith.constant 66 : index
    %184 = memref.load %arg2[%c66] : memref<81xf32, #tpu.memory_space<smem>>
    %185 = vector.broadcast %184 : f32 to vector<16x16xf32>
    %186 = arith.mulf %185, %175 : vector<16x16xf32>
    %187 = arith.addf %173, %186 : vector<16x16xf32>
    %188 = vector.extract_strided_slice %174 {offsets = [0, 1], sizes = [16, 16], strides = [1, 1]} : vector<16x18xf32> to vector<16x16xf32>
    %c13 = arith.constant 13 : index
    %189 = memref.load %arg2[%c13] : memref<81xf32, #tpu.memory_space<smem>>
    %190 = vector.broadcast %189 : f32 to vector<16x16xf32>
    %191 = arith.mulf %190, %188 : vector<16x16xf32>
    %192 = arith.addf %179, %191 : vector<16x16xf32>
    %c40 = arith.constant 40 : index
    %193 = memref.load %arg2[%c40] : memref<81xf32, #tpu.memory_space<smem>>
    %194 = vector.broadcast %193 : f32 to vector<16x16xf32>
    %195 = arith.mulf %194, %188 : vector<16x16xf32>
    %196 = arith.addf %183, %195 : vector<16x16xf32>
    %c67 = arith.constant 67 : index
    %197 = memref.load %arg2[%c67] : memref<81xf32, #tpu.memory_space<smem>>
    %198 = vector.broadcast %197 : f32 to vector<16x16xf32>
    %199 = arith.mulf %198, %188 : vector<16x16xf32>
    %200 = arith.addf %187, %199 : vector<16x16xf32>
    %201 = vector.extract_strided_slice %174 {offsets = [0, 2], sizes = [16, 16], strides = [1, 1]} : vector<16x18xf32> to vector<16x16xf32>
    %c14 = arith.constant 14 : index
    %202 = memref.load %arg2[%c14] : memref<81xf32, #tpu.memory_space<smem>>
    %203 = vector.broadcast %202 : f32 to vector<16x16xf32>
    %204 = arith.mulf %203, %201 : vector<16x16xf32>
    %205 = arith.addf %192, %204 : vector<16x16xf32>
    %c41 = arith.constant 41 : index
    %206 = memref.load %arg2[%c41] : memref<81xf32, #tpu.memory_space<smem>>
    %207 = vector.broadcast %206 : f32 to vector<16x16xf32>
    %208 = arith.mulf %207, %201 : vector<16x16xf32>
    %209 = arith.addf %196, %208 : vector<16x16xf32>
    %c68 = arith.constant 68 : index
    %210 = memref.load %arg2[%c68] : memref<81xf32, #tpu.memory_space<smem>>
    %211 = vector.broadcast %210 : f32 to vector<16x16xf32>
    %212 = arith.mulf %211, %201 : vector<16x16xf32>
    %213 = arith.addf %200, %212 : vector<16x16xf32>
    %214 = vector.extract_strided_slice %133 {offsets = [2, 0], sizes = [16, 18], strides = [1, 1]} : vector<18x18xf32> to vector<16x18xf32>
    %215 = vector.extract_strided_slice %214 {offsets = [0, 0], sizes = [16, 16], strides = [1, 1]} : vector<16x18xf32> to vector<16x16xf32>
    %c15 = arith.constant 15 : index
    %216 = memref.load %arg2[%c15] : memref<81xf32, #tpu.memory_space<smem>>
    %217 = vector.broadcast %216 : f32 to vector<16x16xf32>
    %218 = arith.mulf %217, %215 : vector<16x16xf32>
    %219 = arith.addf %205, %218 : vector<16x16xf32>
    %c42 = arith.constant 42 : index
    %220 = memref.load %arg2[%c42] : memref<81xf32, #tpu.memory_space<smem>>
    %221 = vector.broadcast %220 : f32 to vector<16x16xf32>
    %222 = arith.mulf %221, %215 : vector<16x16xf32>
    %223 = arith.addf %209, %222 : vector<16x16xf32>
    %c69 = arith.constant 69 : index
    %224 = memref.load %arg2[%c69] : memref<81xf32, #tpu.memory_space<smem>>
    %225 = vector.broadcast %224 : f32 to vector<16x16xf32>
    %226 = arith.mulf %225, %215 : vector<16x16xf32>
    %227 = arith.addf %213, %226 : vector<16x16xf32>
    %228 = vector.extract_strided_slice %214 {offsets = [0, 1], sizes = [16, 16], strides = [1, 1]} : vector<16x18xf32> to vector<16x16xf32>
    %c16 = arith.constant 16 : index
    %229 = memref.load %arg2[%c16] : memref<81xf32, #tpu.memory_space<smem>>
    %230 = vector.broadcast %229 : f32 to vector<16x16xf32>
    %231 = arith.mulf %230, %228 : vector<16x16xf32>
    %232 = arith.addf %219, %231 : vector<16x16xf32>
    %c43 = arith.constant 43 : index
    %233 = memref.load %arg2[%c43] : memref<81xf32, #tpu.memory_space<smem>>
    %234 = vector.broadcast %233 : f32 to vector<16x16xf32>
    %235 = arith.mulf %234, %228 : vector<16x16xf32>
    %236 = arith.addf %223, %235 : vector<16x16xf32>
    %c70 = arith.constant 70 : index
    %237 = memref.load %arg2[%c70] : memref<81xf32, #tpu.memory_space<smem>>
    %238 = vector.broadcast %237 : f32 to vector<16x16xf32>
    %239 = arith.mulf %238, %228 : vector<16x16xf32>
    %240 = arith.addf %227, %239 : vector<16x16xf32>
    %241 = vector.extract_strided_slice %214 {offsets = [0, 2], sizes = [16, 16], strides = [1, 1]} : vector<16x18xf32> to vector<16x16xf32>
    %c17 = arith.constant 17 : index
    %242 = memref.load %arg2[%c17] : memref<81xf32, #tpu.memory_space<smem>>
    %243 = vector.broadcast %242 : f32 to vector<16x16xf32>
    %244 = arith.mulf %243, %241 : vector<16x16xf32>
    %245 = arith.addf %232, %244 : vector<16x16xf32>
    %c44 = arith.constant 44 : index
    %246 = memref.load %arg2[%c44] : memref<81xf32, #tpu.memory_space<smem>>
    %247 = vector.broadcast %246 : f32 to vector<16x16xf32>
    %248 = arith.mulf %247, %241 : vector<16x16xf32>
    %249 = arith.addf %236, %248 : vector<16x16xf32>
    %c71 = arith.constant 71 : index
    %250 = memref.load %arg2[%c71] : memref<81xf32, #tpu.memory_space<smem>>
    %251 = vector.broadcast %250 : f32 to vector<16x16xf32>
    %252 = arith.mulf %251, %241 : vector<16x16xf32>
    %253 = arith.addf %240, %252 : vector<16x16xf32>
    %c0_9 = arith.constant 0 : index
    %c2_10 = arith.constant 2 : index
    %254 = arith.index_cast %1 : i32 to index
    %c0_11 = arith.constant 0 : index
    %255 = vector.load %arg4[%c0_9, %c2_10, %254, %c0_11] : memref<1x3x18x18xf32, #tpu.memory_space<vmem>>, vector<1x1x18x18xf32>
    %256 = vector.shape_cast %255 : vector<1x1x18x18xf32> to vector<18x18xf32>
    %257 = vector.extract_strided_slice %256 {offsets = [0, 0], sizes = [16, 18], strides = [1, 1]} : vector<18x18xf32> to vector<16x18xf32>
    %258 = vector.extract_strided_slice %257 {offsets = [0, 0], sizes = [16, 16], strides = [1, 1]} : vector<16x18xf32> to vector<16x16xf32>
    %c18 = arith.constant 18 : index
    %259 = memref.load %arg2[%c18] : memref<81xf32, #tpu.memory_space<smem>>
    %260 = vector.broadcast %259 : f32 to vector<16x16xf32>
    %261 = arith.mulf %260, %258 : vector<16x16xf32>
    %262 = arith.addf %245, %261 : vector<16x16xf32>
    %c45 = arith.constant 45 : index
    %263 = memref.load %arg2[%c45] : memref<81xf32, #tpu.memory_space<smem>>
    %264 = vector.broadcast %263 : f32 to vector<16x16xf32>
    %265 = arith.mulf %264, %258 : vector<16x16xf32>
    %266 = arith.addf %249, %265 : vector<16x16xf32>
    %c72 = arith.constant 72 : index
    %267 = memref.load %arg2[%c72] : memref<81xf32, #tpu.memory_space<smem>>
    %268 = vector.broadcast %267 : f32 to vector<16x16xf32>
    %269 = arith.mulf %268, %258 : vector<16x16xf32>
    %270 = arith.addf %253, %269 : vector<16x16xf32>
    %271 = vector.extract_strided_slice %257 {offsets = [0, 1], sizes = [16, 16], strides = [1, 1]} : vector<16x18xf32> to vector<16x16xf32>
    %c19 = arith.constant 19 : index
    %272 = memref.load %arg2[%c19] : memref<81xf32, #tpu.memory_space<smem>>
    %273 = vector.broadcast %272 : f32 to vector<16x16xf32>
    %274 = arith.mulf %273, %271 : vector<16x16xf32>
    %275 = arith.addf %262, %274 : vector<16x16xf32>
    %c46 = arith.constant 46 : index
    %276 = memref.load %arg2[%c46] : memref<81xf32, #tpu.memory_space<smem>>
    %277 = vector.broadcast %276 : f32 to vector<16x16xf32>
    %278 = arith.mulf %277, %271 : vector<16x16xf32>
    %279 = arith.addf %266, %278 : vector<16x16xf32>
    %c73 = arith.constant 73 : index
    %280 = memref.load %arg2[%c73] : memref<81xf32, #tpu.memory_space<smem>>
    %281 = vector.broadcast %280 : f32 to vector<16x16xf32>
    %282 = arith.mulf %281, %271 : vector<16x16xf32>
    %283 = arith.addf %270, %282 : vector<16x16xf32>
    %284 = vector.extract_strided_slice %257 {offsets = [0, 2], sizes = [16, 16], strides = [1, 1]} : vector<16x18xf32> to vector<16x16xf32>
    %c20 = arith.constant 20 : index
    %285 = memref.load %arg2[%c20] : memref<81xf32, #tpu.memory_space<smem>>
    %286 = vector.broadcast %285 : f32 to vector<16x16xf32>
    %287 = arith.mulf %286, %284 : vector<16x16xf32>
    %288 = arith.addf %275, %287 : vector<16x16xf32>
    %c47 = arith.constant 47 : index
    %289 = memref.load %arg2[%c47] : memref<81xf32, #tpu.memory_space<smem>>
    %290 = vector.broadcast %289 : f32 to vector<16x16xf32>
    %291 = arith.mulf %290, %284 : vector<16x16xf32>
    %292 = arith.addf %279, %291 : vector<16x16xf32>
    %c74 = arith.constant 74 : index
    %293 = memref.load %arg2[%c74] : memref<81xf32, #tpu.memory_space<smem>>
    %294 = vector.broadcast %293 : f32 to vector<16x16xf32>
    %295 = arith.mulf %294, %284 : vector<16x16xf32>
    %296 = arith.addf %283, %295 : vector<16x16xf32>
    %297 = vector.extract_strided_slice %256 {offsets = [1, 0], sizes = [16, 18], strides = [1, 1]} : vector<18x18xf32> to vector<16x18xf32>
    %298 = vector.extract_strided_slice %297 {offsets = [0, 0], sizes = [16, 16], strides = [1, 1]} : vector<16x18xf32> to vector<16x16xf32>
    %c21 = arith.constant 21 : index
    %299 = memref.load %arg2[%c21] : memref<81xf32, #tpu.memory_space<smem>>
    %300 = vector.broadcast %299 : f32 to vector<16x16xf32>
    %301 = arith.mulf %300, %298 : vector<16x16xf32>
    %302 = arith.addf %288, %301 : vector<16x16xf32>
    %c48 = arith.constant 48 : index
    %303 = memref.load %arg2[%c48] : memref<81xf32, #tpu.memory_space<smem>>
    %304 = vector.broadcast %303 : f32 to vector<16x16xf32>
    %305 = arith.mulf %304, %298 : vector<16x16xf32>
    %306 = arith.addf %292, %305 : vector<16x16xf32>
    %c75 = arith.constant 75 : index
    %307 = memref.load %arg2[%c75] : memref<81xf32, #tpu.memory_space<smem>>
    %308 = vector.broadcast %307 : f32 to vector<16x16xf32>
    %309 = arith.mulf %308, %298 : vector<16x16xf32>
    %310 = arith.addf %296, %309 : vector<16x16xf32>
    %311 = vector.extract_strided_slice %297 {offsets = [0, 1], sizes = [16, 16], strides = [1, 1]} : vector<16x18xf32> to vector<16x16xf32>
    %c22 = arith.constant 22 : index
    %312 = memref.load %arg2[%c22] : memref<81xf32, #tpu.memory_space<smem>>
    %313 = vector.broadcast %312 : f32 to vector<16x16xf32>
    %314 = arith.mulf %313, %311 : vector<16x16xf32>
    %315 = arith.addf %302, %314 : vector<16x16xf32>
    %c49 = arith.constant 49 : index
    %316 = memref.load %arg2[%c49] : memref<81xf32, #tpu.memory_space<smem>>
    %317 = vector.broadcast %316 : f32 to vector<16x16xf32>
    %318 = arith.mulf %317, %311 : vector<16x16xf32>
    %319 = arith.addf %306, %318 : vector<16x16xf32>
    %c76 = arith.constant 76 : index
    %320 = memref.load %arg2[%c76] : memref<81xf32, #tpu.memory_space<smem>>
    %321 = vector.broadcast %320 : f32 to vector<16x16xf32>
    %322 = arith.mulf %321, %311 : vector<16x16xf32>
    %323 = arith.addf %310, %322 : vector<16x16xf32>
    %324 = vector.extract_strided_slice %297 {offsets = [0, 2], sizes = [16, 16], strides = [1, 1]} : vector<16x18xf32> to vector<16x16xf32>
    %c23 = arith.constant 23 : index
    %325 = memref.load %arg2[%c23] : memref<81xf32, #tpu.memory_space<smem>>
    %326 = vector.broadcast %325 : f32 to vector<16x16xf32>
    %327 = arith.mulf %326, %324 : vector<16x16xf32>
    %328 = arith.addf %315, %327 : vector<16x16xf32>
    %c50 = arith.constant 50 : index
    %329 = memref.load %arg2[%c50] : memref<81xf32, #tpu.memory_space<smem>>
    %330 = vector.broadcast %329 : f32 to vector<16x16xf32>
    %331 = arith.mulf %330, %324 : vector<16x16xf32>
    %332 = arith.addf %319, %331 : vector<16x16xf32>
    %c77 = arith.constant 77 : index
    %333 = memref.load %arg2[%c77] : memref<81xf32, #tpu.memory_space<smem>>
    %334 = vector.broadcast %333 : f32 to vector<16x16xf32>
    %335 = arith.mulf %334, %324 : vector<16x16xf32>
    %336 = arith.addf %323, %335 : vector<16x16xf32>
    %337 = vector.extract_strided_slice %256 {offsets = [2, 0], sizes = [16, 18], strides = [1, 1]} : vector<18x18xf32> to vector<16x18xf32>
    %338 = vector.extract_strided_slice %337 {offsets = [0, 0], sizes = [16, 16], strides = [1, 1]} : vector<16x18xf32> to vector<16x16xf32>
    %c24 = arith.constant 24 : index
    %339 = memref.load %arg2[%c24] : memref<81xf32, #tpu.memory_space<smem>>
    %340 = vector.broadcast %339 : f32 to vector<16x16xf32>
    %341 = arith.mulf %340, %338 : vector<16x16xf32>
    %342 = arith.addf %328, %341 : vector<16x16xf32>
    %c51 = arith.constant 51 : index
    %343 = memref.load %arg2[%c51] : memref<81xf32, #tpu.memory_space<smem>>
    %344 = vector.broadcast %343 : f32 to vector<16x16xf32>
    %345 = arith.mulf %344, %338 : vector<16x16xf32>
    %346 = arith.addf %332, %345 : vector<16x16xf32>
    %c78 = arith.constant 78 : index
    %347 = memref.load %arg2[%c78] : memref<81xf32, #tpu.memory_space<smem>>
    %348 = vector.broadcast %347 : f32 to vector<16x16xf32>
    %349 = arith.mulf %348, %338 : vector<16x16xf32>
    %350 = arith.addf %336, %349 : vector<16x16xf32>
    %351 = vector.extract_strided_slice %337 {offsets = [0, 1], sizes = [16, 16], strides = [1, 1]} : vector<16x18xf32> to vector<16x16xf32>
    %c25 = arith.constant 25 : index
    %352 = memref.load %arg2[%c25] : memref<81xf32, #tpu.memory_space<smem>>
    %353 = vector.broadcast %352 : f32 to vector<16x16xf32>
    %354 = arith.mulf %353, %351 : vector<16x16xf32>
    %355 = arith.addf %342, %354 : vector<16x16xf32>
    %c52 = arith.constant 52 : index
    %356 = memref.load %arg2[%c52] : memref<81xf32, #tpu.memory_space<smem>>
    %357 = vector.broadcast %356 : f32 to vector<16x16xf32>
    %358 = arith.mulf %357, %351 : vector<16x16xf32>
    %359 = arith.addf %346, %358 : vector<16x16xf32>
    %c79 = arith.constant 79 : index
    %360 = memref.load %arg2[%c79] : memref<81xf32, #tpu.memory_space<smem>>
    %361 = vector.broadcast %360 : f32 to vector<16x16xf32>
    %362 = arith.mulf %361, %351 : vector<16x16xf32>
    %363 = arith.addf %350, %362 : vector<16x16xf32>
    %364 = vector.extract_strided_slice %337 {offsets = [0, 2], sizes = [16, 16], strides = [1, 1]} : vector<16x18xf32> to vector<16x16xf32>
    %c26 = arith.constant 26 : index
    %365 = memref.load %arg2[%c26] : memref<81xf32, #tpu.memory_space<smem>>
    %366 = vector.broadcast %365 : f32 to vector<16x16xf32>
    %367 = arith.mulf %366, %364 : vector<16x16xf32>
    %368 = arith.addf %355, %367 : vector<16x16xf32>
    %c53 = arith.constant 53 : index
    %369 = memref.load %arg2[%c53] : memref<81xf32, #tpu.memory_space<smem>>
    %370 = vector.broadcast %369 : f32 to vector<16x16xf32>
    %371 = arith.mulf %370, %364 : vector<16x16xf32>
    %372 = arith.addf %359, %371 : vector<16x16xf32>
    %c80 = arith.constant 80 : index
    %373 = memref.load %arg2[%c80] : memref<81xf32, #tpu.memory_space<smem>>
    %374 = vector.broadcast %373 : f32 to vector<16x16xf32>
    %375 = arith.mulf %374, %364 : vector<16x16xf32>
    %376 = arith.addf %363, %375 : vector<16x16xf32>
    %c0_12 = arith.constant 0 : index
    %c0_13 = arith.constant 0 : index
    %c0_14 = arith.constant 0 : index
    %c0_15 = arith.constant 0 : index
    %377 = vector.load %arg5[%c0_12, %c0_13, %c0_14, %c0_15] : memref<1x3x16x16xf32, #tpu.memory_space<vmem>>, vector<1x1x16x16xf32>
    %378 = vector.shape_cast %377 : vector<1x1x16x16xf32> to vector<16x16xf32>
    %379 = vector.shape_cast %368 : vector<16x16xf32> to vector<1x1x16x16xf32>
    tpu.vector_store %arg5[%c0_12, %c0_13, %c0_14, %c0_15], %379 {strides = array<i32>} : memref<1x3x16x16xf32, #tpu.memory_space<vmem>>, vector<1x1x16x16xf32>,
    %c0_16 = arith.constant 0 : index
    %c1_17 = arith.constant 1 : index
    %c0_18 = arith.constant 0 : index
    %c0_19 = arith.constant 0 : index
    %380 = vector.load %arg5[%c0_16, %c1_17, %c0_18, %c0_19] : memref<1x3x16x16xf32, #tpu.memory_space<vmem>>, vector<1x1x16x16xf32>
    %381 = vector.shape_cast %380 : vector<1x1x16x16xf32> to vector<16x16xf32>
    %382 = vector.shape_cast %372 : vector<16x16xf32> to vector<1x1x16x16xf32>
    tpu.vector_store %arg5[%c0_16, %c1_17, %c0_18, %c0_19], %382 {strides = array<i32>} : memref<1x3x16x16xf32, #tpu.memory_space<vmem>>, vector<1x1x16x16xf32>,
    %c0_20 = arith.constant 0 : index
    %c2_21 = arith.constant 2 : index
    %c0_22 = arith.constant 0 : index
    %c0_23 = arith.constant 0 : index
    %383 = vector.load %arg5[%c0_20, %c2_21, %c0_22, %c0_23] : memref<1x3x16x16xf32, #tpu.memory_space<vmem>>, vector<1x1x16x16xf32>
    %384 = vector.shape_cast %383 : vector<1x1x16x16xf32> to vector<16x16xf32>
    %385 = vector.shape_cast %376 : vector<16x16xf32> to vector<1x1x16x16xf32>
    tpu.vector_store %arg5[%c0_20, %c2_21, %c0_22, %c0_23], %385 {strides = array<i32>} : memref<1x3x16x16xf32, #tpu.memory_space<vmem>>, vector<1x1x16x16xf32>,
    return
  }
  func.func @transform_0(%arg0: i32, %arg1: i32) -> i32 {
    %c0_i32 = arith.constant 0 : i32
    %c0_i32_0 = arith.constant 0 : i32
    return %c0_i32 : i32
  }
  func.func @transform_1(%arg0: i32, %arg1: i32) -> i32 {
    %c0_i32 = arith.constant 0 : i32
    %c0_i32_0 = arith.constant 0 : i32
    return %c0_i32 : i32
  }
  func.func @transform_2(%arg0: i32, %arg1: i32) -> (i32, i32, i32, i32) {
    %c0_i32 = arith.constant 0 : i32
    %c0_i32_0 = arith.constant 0 : i32
    %c0_i32_1 = arith.constant 0 : i32
    %c0_i32_2 = arith.constant 0 : i32
    return %arg0, %c0_i32, %c0_i32_0, %c0_i32_1 : i32, i32, i32, i32
  }
  func.func @transform_3(%arg0: i32, %arg1: i32) -> (i32, i32, i32, i32) {
    %c0_i32 = arith.constant 0 : i32
    %c0_i32_0 = arith.constant 0 : i32
    %c0_i32_1 = arith.constant 0 : i32
    return %arg0, %c0_i32, %arg1, %c0_i32_0 : i32, i32, i32, i32
  }
}

</mosaic_0001>

<bundles_post_ra>
// kernel: conv3x3_pallas.1
= control target key start
LH: loop header
LB: loop body
LE: loop exit
PB: predicated region body
PF: predicated region fallthrough
CT: control target
= control target key end

     0   :  { %8 = vsyncpa [#allocation4], 0  ;;  %s2965_s0 = inlined_call_operand.vmem [shape: f32[81], index: 0, kind: input, shape index: {}]   ;;  %s2966_s1 = inlined_call_operand.vmem [shape: f32[3], index: 1, kind: input, shape index: {}]   ;;  %s2967_s2 = inlined_call_operand.vmem [shape: f32[2,3,18,18], index: 2, kind: input, shape index: {}]   ;;  %s2968_s3 = inlined_call_operand.hbm [shape: f32[2,3,16,16], index: 3, kind: output, shape index: {}]  }
   0x1   :  { %9 = vsyncpa [#allocation6], 0 }
   0x2   :  { %10 = vsyncpa [#allocation3], 0 }
   0x3   :  { %12 = vsyncpa [#allocation3 + $0x1], 0  ;;  %s2070_s12 = smov 0   ;;  %s2072_s13 = smov 0  }
   0x4   :  { %s2074_s14 = smov 0   ;;  %s2076_s15 = smov 0  }
   0x5   :  { %s2078_s16 = smov 0   ;;  %s2080_s17 = smov 0  }
   0x6 LB: > { %s1730_s18 = sadd.s32 4294967295, %s2041_s17   ;;  %s1731_s19 = sadd.s32 4294967294, %s2041_s17   ;;  %s2041_s17 = sphi %s2080_s17, %s18_s17   ;;  %s2037_s16 = sphi %s2078_s16, %s2990_s16   ;;  %s2033_s15 = sphi %s2076_s15, %s2989_s15   ;;  %s2029_s14 = sphi %s2074_s14, %s2988_s14   ;;  %s2025_s13 = sphi %s2072_s13, %s2987_s13   ;;  %s2021_s12 = sphi %s2070_s12, %s2986_s12  }
   0x7   : > { %s30_s20 = sadd.s32 1, %s2037_s16  ;;  %s107_s21 = sadd.s32 1, %s2029_s14 }
   0x8   : > { %p32_p0 = scmp.ge.s32.totalorder %s30_s20, 2  ;;  %p117_p1 = scmp.ne.s32.totalorder %s2029_s14, %s2025_s13 }
   0x9   : > { %p118_p2 = scmp.eq.s32.totalorder %s1730_s18, 1  ;;  %p123_p3 = scmp.ne.s32.totalorder %s2025_s13, %s2021_s12 }
   0xa   : > { %s2992_s20 = smov (%p32_p0, %s30_s20), 0  ;;  %p124_p5 = scmp.eq.s32.totalorder %s1731_s19, 1 }
   0xb   : > { %p2110_p4 = por %p118_p2, %p117_p1  ;;  %s102_s23 = ssub.s32 %s2037_s16, %s2992_s20 }
   0xc   : > { %p1732_p6 = scmp.ge.s32.totalorder %s2041_s17, 1  ;;  %p105_p7 = scmp.eq.s32.totalorder %s102_s23, 0 }
   0xd   : > { %s2973_s22 = scalar_select %p2110_p4, 1, 0 }
   0xe   : > { %p2117_p8 = por %p124_p5, %p123_p3  ;;  %p131_p9 = scmp.lt.s32.totalorder %s2041_s17, 3 }
   0xf   : > { %s2123_s25 = scalar_select %p105_p7, %s2029_s14, %s107_s21  }
  0x10   : > { %s2974_s24 = scalar_select %p2117_p8, 1, 0 }
  0x11   : > { %p2125_p10 = pnand %p1732_p6, %p131_p9  ;;  %p2129_p11 = scmp.eq.s32.totalorder %s1730_s18, 0 }
  0x12   : > { %s144_s30 = sshll.u32 %s2965_s0, 4  ;;  %s155_s6 = sshll.u32 %s2966_s1, 4  ;;  %s145_s30 = int_to_ptr.vmem [resolvable:$true] %s144_s30  ;;  %s156_s6 = int_to_ptr.vmem [resolvable:$true] %s155_s6 }
  0x13   : > { %s2975_s26 = scalar_select %p2125_p10, 1, 0 }
  0x14   : > { %s2976_s27 = scalar_select %p2129_p11, 1, 0 }
  0x15   : > { %p1848_p12 = pneg %p2125_p10  ;;  %s1925_s8 = scalar_lea.vmem %s145_s30, 16 }
  0x16   : > { %p1926_p0 = scmp.ne.s32.totalorder %s145_s30, %s1925_s8  ;;  %p1933_p5 = scmp.lt.s32.totalorder %s145_s30, %s145_s30 }
  0x17   : > { %p2143_p13 = pnand %p2129_p11, %p1848_p12  ;;  %p1934_p6 = scmp.lt.s32.totalorder %s1925_s8, %s1925_s8 }
  0x19   : > { %p1927_p1 = pneg %p2143_p13  ;;  %p1935_p7 = por %p1934_p6, %p1933_p5 }
  0x1b   : > { %p1928_p2 = pnand %p1927_p1, %p1926_p0 }
  0x1d   : > { %p1929_p3 = pneg %p1928_p2 }
  0x1f   : > { %p1936_p9 = pnand %p1935_p7, %p1929_p3 }
  0x21   : > { %1939 = shalt.err (!%p1936_p9)
}
  0x22   : > { %s2043_s9 = smov [#allocation2]   ;;  %s1940_s10 = scalar_lea.vmem %s156_s6, 16 }
  0x23   : > { %1851 = dma.vmem_to_smem (!%p2143_p13), %s145_s30, 16, %s2043_s9, [#allocation4]  }
  0x24   : > { %p1941_p12 = scmp.ne.s32.totalorder %s156_s6, %s1940_s10  ;;  %p1948_p11 = scmp.lt.s32.totalorder %s156_s6, %s156_s6 }
  0x25   : > { %p1949_p10 = scmp.lt.s32.totalorder %s1940_s10, %s1940_s10 }
  0x26   : > { %p1943_p8 = pnand %p1941_p12, %p1927_p1 }
  0x27   : > { %p1950_p0 = por %p1949_p10, %p1948_p11 }
  0x28   : > { %p1944_p4 = pneg %p1943_p8 }
  0x2a   : > { %p1951_p2 = pnand %p1950_p0, %p1944_p4 }
  0x2c   : > { %1954 = shalt.err (!%p1951_p2)
}
  0x2d   : > { %s2044_s11 = smov [#allocation5]   ;;  %p2978_p3 = scmp.ne.s32.totalorder %s2975_s26, 0 }
  0x2e   : > { %1854 = dma.vmem_to_smem (!%p2143_p13), %s156_s6, 16, %s2044_s11, [#allocation6]  }
  0x2f   : > { %176 = sbr.rel (%p2978_p3) target bundleno = 415 (0x19f), region = 32 }
  0x36   : > { %p2979_p5 = scmp.ne.s32.totalorder %s2976_s27, 0 }
  0x38   : > { %2008 = dma.done.wait (%p2979_p5), [#allocation4], 16  }
  0x39   : > { %2010 = vsyncadd (%p2979_p5), [#allocation4], 4294967280 }
  0x3a   : > { %2012 = dma.done.wait (%p2979_p5), [#allocation6], 16  }
  0x3b   : > { %2014 = vsyncadd (%p2979_p5), [#allocation6], 4294967280 }
  0x3c   : > { %186 = sfence }
  0x3d   : > { %p205_p4 = scmp.lt.s32.totalorder %s2033_s15, 1  ;;  %s1745_s18 = sld [smem:[#allocation2 + $0x1c]]  ;;  %vm332_vm0 = vcmask 1046528   ;;  %vm510_vm1 = vcmask 1045504   ;;  %vm1602_vm2 = vcmask 130048  }
  0x3e   : > { %s1744_s19 = sld [smem:[#allocation2 + $0x1]]  ;;  %s1746_s23 = sld [smem:[#allocation2 + $0x37]] }
  0x3f   : > { %s206_s21 = scalar_select %p205_p4, %s2033_s15, 1 }
  0x40   : > { %s1747_s27 = sld [smem:[#allocation2 + $0x2]]  ;;  %s2045_s4 = smov 127  }
  0x41   : > { %s1836_s26 = smul.u32 72, %s206_s21  ;;  %s1748_s5 = sld [smem:[#allocation2 + $0x1d]] }
  0x42   : > { %s1753_s6 = sld [smem:[#allocation2 + $0x4]]  ;;  %s1749_s7 = sld [smem:[#allocation2 + $0x38]] }
  0x43   : > { %s2168_s30 = scalar_lea.vmem %s2967_s2, %s1836_s26  ;;  %v255_v2 = vstv %s1745_s18  ;;  %s1754_s8 = sld [smem:[#allocation2 + $0x1f]] }
  0x44   : > { %v2171_v0 = vld [vmem:[%s2168_s30] sm:$0xff]  ;;  %v2174_v1 = vld [vmem:[%s2168_s30 + $0x8] sm:$0xff]  ;;  %v241_v3 = vstv %s1744_s19  ;;  %v269_v8 = vstv %s1746_s23  ;;  %s1755_s9 = sld [smem:[#allocation2 + $0x3a]]  ;;  %s2046_s10 = smov 126  }
  0x45   : > { %v256_v4 = vmul.f32 %v255_v2, %v2171_v0  ;;  %v242_v5 = vmul.f32 %v241_v3, %v2171_v0  ;;  %v257_v6 = vmul.f32 %v255_v2, %v2174_v1  ;;  %v243_v7 = vmul.f32 %v241_v3, %v2174_v1  ;;  %v2191_v15 = vld [vmem:[%s2168_s30 + $0x10] sm:$0x3]  ;;  %s1756_s11 = sld [smem:[#allocation2 + $0x5]]  ;;  %s1757_s18 = sld [smem:[#allocation2 + $0x20]] }
  0x46   : > { %v271_v9 = vmul.f32 %v269_v8, %v2174_v1  ;;  %v270_v10 = vmul.f32 %v269_v8, %v2171_v0  ;;  %v283_v11 = vstv %s1747_s27  ;;  %s1758_s19 = sld [smem:[#allocation2 + $0x3b]]  ;;  %s1762_s21 = sld [smem:[#allocation2 + $0x7]] }
  0x47   : > { %260 = vrot.lane.b32.xlu1 %v256_v4, %s2045_s4  ;;  %246 = vrot.lane.b32.xlu0 %v242_v5, %s2045_s4  ;;  %v285_v12 = vmul.f32 %v283_v11, %v2174_v1  ;;  %v284_v13 = vmul.f32 %v283_v11, %v2171_v0  ;;  %v297_v14 = vstv %s1748_s5  ;;  %s1763_s23 = sld [smem:[#allocation2 + $0x22]]  ;;  %s1764_s26 = sld [smem:[#allocation2 + $0x3d]] }
  0x48   : > { %v377_v16 = vstv %s1753_s6  ;;  %v299_v17 = vmul.f32 %v297_v14, %v2174_v1  ;;  %v298_v18 = vmul.f32 %v297_v14, %v2171_v0  ;;  %v311_v19 = vstv %s1749_s7  ;;  %s1765_s28 = sld [smem:[#allocation2 + $0x8]]  ;;  %s1766_s29 = sld [smem:[#allocation2 + $0x23]] }
  0x49   : > { %v379_v20 = vmul.f32 %v377_v16, %v2174_v1  ;;  %v380_v21 = vmul.f32 %v377_v16, %v2191_v15  ;;  %v378_v22 = vmul.f32 %v377_v16, %v2171_v0  ;;  %v398_v23 = vstv %s1754_s8  ;;  %s1767_s27 = sld [smem:[#allocation2 + $0x3e]]  ;;  %s1774_s5 = sld [smem:[#allocation2 + $0xa]] }
  0x4a   : > { %v313_v24 = vmul.f32 %v311_v19, %v2174_v1  ;;  %v312_v25 = vmul.f32 %v311_v19, %v2171_v0  ;;  %v400_v26 = vmul.f32 %v398_v23, %v2174_v1  ;;  %v401_v27 = vmul.f32 %v398_v23, %v2191_v15  ;;  %s1775_s6 = sld [smem:[#allocation2 + $0x25]]  ;;  %s1776_s7 = sld [smem:[#allocation2 + $0x40]] }
  0x4b   : > { %262 = vrot.lane.b32.xlu1 %v257_v6, %s2045_s4  ;;  %248 = vrot.lane.b32.xlu0 %v243_v7, %s2045_s4  ;;  %v419_v28 = vstv %s1755_s9  ;;  %v385_v29 = vrot.slane %v379_v20, 1  ;;  %v387_v30 = vrot.slane %v380_v21, 1  ;;  %v384_v31 = vrot.slane %v378_v22, 1  ;;  %s1777_s8 = sld [smem:[#allocation2 + $0xb]]  ;;  %s1778_s9 = sld [smem:[#allocation2 + $0x26]] }
  0x4c   : > { %v399_v32 = vmul.f32 %v398_v23, %v2171_v0  ;;  %v421_v33 = vmul.f32 %v419_v28, %v2174_v1  ;;  %v406_v34 = vrot.slane %v400_v26, 1  ;;  %v408_v35 = vrot.slane %v401_v27, 1  ;;  %p2984_p10 = scmp.ne.s32.totalorder %s2973_s22, 0 }
  0x4d   : > { %v422_v36 = vmul.f32 %v419_v28, %v2191_v15  ;;  %v440_v37 = vstv %s1756_s11  ;;  %v388_v38 = vsel %vm332_vm0, %v385_v29, %v387_v30  ;;  %v386_v39 = vsel %vm332_vm0, %v384_v31, %v385_v29  ;;  %s1783_s11 = sld [smem:[#allocation2 + $0xd]] }
  0x4e   : > { %v405_v40 = vrot.slane %v399_v32, 1  ;;  %v420_v41 = vmul.f32 %v419_v28, %v2171_v0  ;;  %v427_v42 = vrot.slane %v421_v33, 1  ;;  %v442_v43 = vmul.f32 %v440_v37, %v2174_v1 }
  0x4f   : > { %276 = vrot.lane.b32.xlu1 %v271_v9, %s2045_s4  ;;  %274 = vrot.lane.b32.xlu0 %v270_v10, %s2045_s4  ;;  %v443_v44 = vmul.f32 %v440_v37, %v2191_v15  ;;  %v441_v45 = vmul.f32 %v440_v37, %v2171_v0  ;;  %v461_v46 = vstv %s1757_s18  ;;  %v409_v47 = vsel %vm332_vm0, %v406_v34, %v408_v35  ;;  %s1779_s18 = sld [smem:[#allocation2 + $0x41]] }
  0x50   : > { %v407_v48 = vsel %vm332_vm0, %v405_v40, %v406_v34  ;;  %v429_v49 = vrot.slane %v422_v36, 1  ;;  %v426_v50 = vrot.slane %v420_v41, 1  ;;  %v463_v51 = vmul.f32 %v461_v46, %v2174_v1 }
  0x51   : > { %v464_v52 = vmul.f32 %v461_v46, %v2191_v15  ;;  %v448_v53 = vrot.slane %v442_v43, 1  ;;  %v450_v54 = vrot.slane %v443_v44, 1  ;;  %v447_v55 = vrot.slane %v441_v45, 1 }
  0x52   : > { %v430_v56 = vsel %vm332_vm0, %v427_v42, %v429_v49  ;;  %v428_v57 = vsel %vm332_vm0, %v426_v50, %v427_v42  ;;  %v462_v58 = vmul.f32 %v461_v46, %v2171_v0  ;;  %v482_v59 = vstv %s1758_s19  ;;  %s1784_s19 = sld [smem:[#allocation2 + $0x28]] }
  0x53   : > { %290 = vrot.lane.b32.xlu1 %v285_v12, %s2046_s10  ;;  %288 = vrot.lane.b32.xlu0 %v284_v13, %s2046_s10  ;;  %v469_v60 = vrot.slane %v463_v51, 1  ;;  %v471_v61 = vrot.slane %v464_v52, 1  ;;  %v451_v62 = vsel %vm332_vm0, %v448_v53, %v450_v54  ;;  %v449_v63 = vsel %vm332_vm0, %v447_v55, %v448_v53 }
  0x54   : > { %v484_v2 = vmul.f32 %v482_v59, %v2174_v1  ;;  %v468_v3 = vrot.slane %v462_v58, 1  ;;  %v485_v4 = vmul.f32 %v482_v59, %v2191_v15  ;;  %v483_v5 = vmul.f32 %v482_v59, %v2171_v0 }
  0x55   : > { %v555_v6 = vstv %s1762_s21  ;;  %v472_v7 = vsel %vm332_vm0, %v469_v60, %v471_v61  ;;  %v576_v11 = vstv %s1763_s23  ;;  %v618_v30 = vstv %s1765_s28  ;;  %s1785_s21 = sld [smem:[#allocation2 + $0x43]]  ;;  %s1786_s23 = sld [smem:[#allocation2 + $0xe]] }
  0x56   : > { %v490_v8 = vrot.slane %v484_v2, 1  ;;  %v557_v9 = vmul.f32 %v555_v6, %v2174_v1  ;;  %v558_v10 = vmul.f32 %v555_v6, %v2191_v15  ;;  %v470_v12 = vsel %vm332_vm0, %v468_v3, %v469_v60  ;;  %s1788_s28 = sld [smem:[#allocation2 + $0x44]] }
  0x57   : > { %304 = vrot.lane.b32.xlu1 %v299_v17, %s2046_s10  ;;  %302 = vrot.lane.b32.xlu0 %v298_v18, %s2046_s10  ;;  %v492_v13 = vrot.slane %v485_v4, 1  ;;  %v489_v14 = vrot.slane %v483_v5, 1  ;;  %v556_v16 = vmul.f32 %v555_v6, %v2171_v0  ;;  %v578_v17 = vmul.f32 %v576_v11, %v2174_v1  ;;  %v2286_v6 = vld [vmem:[%s2168_s30 + $0x20] sm:$0xff] }
  0x58   : > { %v579_v18 = vmul.f32 %v576_v11, %v2191_v15  ;;  %v563_v19 = vrot.slane %v557_v9, 2  ;;  %v565_v20 = vrot.slane %v558_v10, 2  ;;  %v577_v21 = vmul.f32 %v576_v11, %v2171_v0 }
  0x59   : > { %v493_v22 = vsel %vm332_vm0, %v490_v8, %v492_v13  ;;  %v491_v23 = vsel %vm332_vm0, %v489_v14, %v490_v8  ;;  %v584_v26 = vrot.slane %v578_v17, 2  ;;  %v620_v36 = vmul.f32 %v618_v30, %v2174_v1  ;;  %v2289_v8 = vld [vmem:[%s2168_s30 + $0x18] sm:$0xff] }
  0x5a   : > { %v586_v27 = vrot.slane %v579_v18, 2  ;;  %v566_v28 = vsel %vm510_vm1, %v563_v19, %v565_v20  ;;  %v583_v29 = vrot.slane %v577_v21, 2  ;;  %v639_v43 = vstv %s1766_s29  ;;  %s1792_s29 = sld [smem:[#allocation2 + $0x10]] }
  0x5b   : > { %318 = vrot.lane.b32.xlu1 %v313_v24, %s2046_s10  ;;  %316 = vrot.lane.b32.xlu0 %v312_v25, %s2046_s10  ;;  %v562_v24 = vrot.slane %v556_v16, 2  ;;  %v597_v25 = vstv %s1764_s26  ;;  %v626_v44 = vrot.slane %v620_v36, 2  ;;  %v640_v51 = vmul.f32 %v639_v43, %v2171_v0  ;;  %s1787_s26 = sld [smem:[#allocation2 + $0x29]] }
  0x5c   : > { %v599_v32 = vmul.f32 %v597_v25, %v2174_v1  ;;  %v600_v33 = vmul.f32 %v597_v25, %v2191_v15  ;;  %v598_v34 = vmul.f32 %v597_v25, %v2171_v0  ;;  %v587_v35 = vsel %vm510_vm1, %v584_v26, %v586_v27 }
  0x5d   : > { %v564_v31 = vsel %vm510_vm1, %v562_v24, %v563_v19  ;;  %v585_v37 = vsel %vm510_vm1, %v583_v29, %v584_v26  ;;  %v660_v52 = vstv %s1767_s27  ;;  %v718_v11 = vstv %s1775_s6  ;;  %s1793_s27 = sld [smem:[#allocation2 + $0x2b]]  ;;  %s1795_s6 = sld [smem:[#allocation2 + $0x11]] }
  0x5e   : > { %v605_v40 = vrot.slane %v599_v32, 2  ;;  %v607_v41 = vrot.slane %v600_v33, 2  ;;  %v604_v42 = vrot.slane %v598_v34, 2  ;;  %v662_v58 = vmul.f32 %v660_v52, %v2174_v1 }
  0x5f   : > { %391 = vrot.lane.b32.xlu1 %v388_v38, %s2045_s4  ;;  %389 = vrot.lane.b32.xlu0 %v386_v39, %s2045_s4  ;;  %v621_v38 = vmul.f32 %v618_v30, %v2191_v15  ;;  %v619_v39 = vmul.f32 %v618_v30, %v2171_v0  ;;  %v663_v59 = vmul.f32 %v660_v52, %v2191_v15  ;;  %v732_v14 = vstv %s1776_s7  ;;  %s2361_s7 = sld [smem:[#allocation2 + $0x1b]] }
  0x60   : > { %v608_v49 = vsel %vm510_vm1, %v605_v40, %v607_v41  ;;  %v606_v50 = vsel %vm510_vm1, %v604_v42, %v605_v40  ;;  %v661_v60 = vmul.f32 %v660_v52, %v2171_v0  ;;  %v719_v13 = vmul.f32 %v2289_v8, %v718_v11 }
  0x61   : > { %v628_v45 = vrot.slane %v621_v38, 2  ;;  %v625_v46 = vrot.slane %v619_v39, 2  ;;  %v670_v2 = vrot.slane %v663_v59, 2  ;;  %v734_v16 = vmul.f32 %v2286_v6, %v732_v14 }
  0x62   : > { %v667_v3 = vrot.slane %v661_v60, 2  ;;  %v733_v17 = vmul.f32 %v2289_v8, %v732_v14  ;;  %v746_v18 = vstv %s1777_s8  ;;  %v760_v21 = vstv %s1778_s9  ;;  %s2368_s8 = sld [smem:[#allocation2 + $0x2c]]  ;;  %s2374_s9 = sld [smem:[#allocation2]] }
  0x63   : > { %412 = vrot.lane.b32.xlu1 %v409_v47, %s2045_s4  ;;  %410 = vrot.lane.b32.xlu0 %v407_v48, %s2045_s4  ;;  %v641_v47 = vmul.f32 %v639_v43, %v2174_v1  ;;  %v642_v48 = vmul.f32 %v639_v43, %v2191_v15  ;;  %v629_v53 = vsel %vm510_vm1, %v626_v44, %v628_v45  ;;  %v774_v26 = vstv %s1779_s18  ;;  %s2385_s18 = sld [smem:[#allocation5]] }
  0x64   : > { %v627_v54 = vsel %vm510_vm1, %v625_v46, %v626_v44  ;;  %v748_v19 = vmul.f32 %v2286_v6, %v746_v18  ;;  %v747_v20 = vmul.f32 %v2289_v8, %v746_v18  ;;  %v762_v24 = vmul.f32 %v2286_v6, %v760_v21 }
  0x65   : > { %v647_v55 = vrot.slane %v641_v47, 2  ;;  %v761_v25 = vmul.f32 %v2289_v8, %v760_v21  ;;  %v860_v30 = vstv %s1784_s19  ;;  %v775_v32 = vmul.f32 %v2289_v8, %v774_v26  ;;  %s2391_s19 = sld [smem:[#allocation2 + $0x47]] }
  0x66   : > { %v862_v33 = vmul.f32 %v2286_v6, %v860_v30  ;;  %v861_v39 = vmul.f32 %v2289_v8, %v860_v30 }
  0x67   : > { %433 = vrot.lane.b32.xlu1 %v430_v56, %s2045_s4  ;;  %431 = vrot.lane.b32.xlu0 %v428_v57, %s2045_s4  ;;  %v649_v56 = vrot.slane %v642_v48, 2  ;;  %v646_v57 = vrot.slane %v640_v51, 2  ;;  %v902_v48 = vstv %s1786_s23  ;;  %s2401_s23 = sld [smem:[#allocation2 + $0x3]] }
  0x68   : > { %v868_v42 = vrot.slane %v862_v33, 1  ;;  %v867_v47 = vrot.slane %v861_v39, 1 }
  0x69   : > { %v650_v61 = vsel %vm510_vm1, %v647_v55, %v649_v56 }
  0x6b   : > { %454 = vrot.lane.b32.xlu1 %v451_v62, %s2046_s10  ;;  %452 = vrot.lane.b32.xlu0 %v449_v63, %s2046_s10  ;;  %v648_v62 = vsel %vm510_vm1, %v646_v57, %v647_v55  ;;  %v668_v63 = vrot.slane %v662_v58, 2  ;;  %v904_v55 = vmul.f32 %v2286_v6, %v902_v48  ;;  %v903_v57 = vmul.f32 %v2289_v8, %v902_v48 }
  0x6d   : > { %v671_v4 = vsel %vm510_vm1, %v668_v63, %v670_v2  ;;  %v669_v5 = vsel %vm510_vm1, %v667_v3, %v668_v63  ;;  %v910_v63 = vrot.slane %v904_v55, 1  ;;  %v909_v3 = vrot.slane %v903_v57, 1 }
  0x6f   : > { %475 = vrot.lane.b32.xlu1 %v472_v7, %s2046_s10  ;;  %473 = vrot.lane.b32.xlu0 %v470_v12, %s2046_s10  ;;  %v704_v7 = vstv %s1774_s5  ;;  %v720_v12 = vmul.f32 %v2286_v6, %v718_v11  ;;  %v1016_v11 = vstv %s1792_s29  ;;  %s1794_s5 = sld [smem:[#allocation2 + $0x46]]  ;;  %s2417_s29 = sld [smem:[#allocation5 + $0x2]] }
  0x70   : > { %v706_v9 = vmul.f32 %v2286_v6, %v704_v7  ;;  %v705_v10 = vmul.f32 %v2289_v8, %v704_v7 }
  0x73   : > { %496 = vrot.lane.b32.xlu1 %v493_v22, %s2046_s10  ;;  %494 = vrot.lane.b32.xlu0 %v491_v23, %s2046_s10  ;;  %v2308_v22 = vld [vmem:[%s2168_s30 + $0x28] sm:$0x3]  ;;  %v839_v23 = vstv %s1783_s11  ;;  %s2377_s11 = sld [smem:[#allocation5 + $0x1]] }
  0x74   : > { %v841_v27 = vmul.f32 %v2286_v6, %v839_v23  ;;  %v840_v29 = vmul.f32 %v2289_v8, %v839_v23  ;;  %v863_v34 = vmul.f32 %v2308_v22, %v860_v30  ;;  %v905_v56 = vmul.f32 %v2308_v22, %v902_v48 }
  0x75   : > { %v1019_v21 = vmul.f32 %v2308_v22, %v1016_v11 }
  0x76   : > { %v847_v36 = vrot.slane %v841_v27, 1  ;;  %v846_v38 = vrot.slane %v840_v29, 1  ;;  %v870_v43 = vrot.slane %v863_v34, 1  ;;  %v912_v2 = vrot.slane %v905_v56, 1 }
  0x77   : > { %569 = vrot.lane.b32.xlu1 %v566_v28, %s2045_s4  ;;  %567 = vrot.lane.b32.xlu0 %v564_v31, %s2045_s4  ;;  %v842_v28 = vmul.f32 %v2308_v22, %v839_v23  ;;  %v776_v31 = vmul.f32 %v2286_v6, %v774_v26  ;;  %v1037_v26 = vstv %s1793_s27  ;;  %s2441_s27 = sld [smem:[#allocation2 + $0x13]] }
  0x78   : > { %v848_v46 = vsel %vm332_vm0, %v846_v38, %v847_v36  ;;  %v871_v51 = vsel %vm332_vm0, %v868_v42, %v870_v43  ;;  %v1039_v29 = vmul.f32 %v2286_v6, %v1037_v26  ;;  %v1040_v30 = vmul.f32 %v2308_v22, %v1037_v26 }
  0x7a   : > { %v1045_v39 = vrot.slane %v1039_v29, 2 }
  0x7b   : > { %590 = vrot.lane.b32.xlu1 %v587_v35, %s2045_s4  ;;  %588 = vrot.lane.b32.xlu0 %v585_v37, %s2045_s4  ;;  %v881_v35 = vstv %s1785_s21  ;;  %v849_v37 = vrot.slane %v842_v28, 1  ;;  %v1026_v28 = vrot.slane %v1019_v21, 2  ;;  %s2393_s21 = sld [smem:[#allocation2 + $0x36]] }
  0x7c   : > { %v883_v40 = vmul.f32 %v2286_v6, %v881_v35  ;;  %v884_v41 = vmul.f32 %v2308_v22, %v881_v35  ;;  %v882_v44 = vmul.f32 %v2289_v8, %v881_v35  ;;  %v1038_v35 = vmul.f32 %v2289_v8, %v1037_v26 }
  0x7d   : > { %v850_v45 = vsel %vm332_vm0, %v847_v36, %v849_v37  ;;  %v325_v26 = vstv %s2401_s23  ;;  %s2541_s23 = sld [smem:[#allocation2 + $0x31]] }
  0x7e   : > { %v888_v52 = vrot.slane %v882_v44, 1 }
  0x7f   : > { %611 = vrot.lane.b32.xlu1 %v608_v49, %s2045_s4  ;;  %609 = vrot.lane.b32.xlu0 %v606_v50, %s2045_s4  ;;  %v889_v49 = vrot.slane %v883_v40, 1  ;;  %v891_v50 = vrot.slane %v884_v41, 1  ;;  %v1047_v40 = vrot.slane %v1040_v30, 2 }
  0x81   : > { %v892_v58 = vsel %vm332_vm0, %v889_v49, %v891_v50  ;;  %v890_v60 = vsel %vm332_vm0, %v888_v52, %v889_v49  ;;  %v1048_v52 = vsel %vm510_vm1, %v1045_v39, %v1047_v40  ;;  %v2456_v40 = vmul.f32 %v325_v26, %v2174_v1 }
  0x83   : > { %632 = vrot.lane.b32.xlu1 %v629_v53, %s2046_s10  ;;  %630 = vrot.lane.b32.xlu0 %v627_v54, %s2046_s10  ;;  %v923_v53 = vstv %s1787_s26  ;;  %v869_v54 = vsel %vm332_vm0, %v867_v47, %v868_v42  ;;  %v1079_v42 = vstv %s1795_s6  ;;  %s2410_s26 = sld [smem:[#allocation2 + $0x1e]]  ;;  %s2469_s6 = sld [smem:[#allocation2 + $0x49]] }
  0x84   : > { %v925_v59 = vmul.f32 %v2286_v6, %v923_v53  ;;  %v1081_v49 = vmul.f32 %v2286_v6, %v1079_v42  ;;  %v1082_v50 = vmul.f32 %v2308_v22, %v1079_v42  ;;  %v1080_v57 = vmul.f32 %v2289_v8, %v1079_v42 }
  0x85   : > { %v217_v42 = vstv %s2417_s29  ;;  %s2582_s29 = sld [smem:[#allocation2 + $0x32]] }
  0x87   : > { %653 = vrot.lane.b32.xlu1 %v650_v61, %s2046_s10  ;;  %651 = vrot.lane.b32.xlu0 %v648_v62, %s2046_s10  ;;  %v926_v61 = vmul.f32 %v2308_v22, %v923_v53  ;;  %v924_v62 = vmul.f32 %v2289_v8, %v923_v53 }
  0x89   : > { %v933_v7 = vrot.slane %v926_v61, 1 }
  0x8b   : > { %674 = vrot.lane.b32.xlu1 %v671_v4, %s2046_s10  ;;  %672 = vrot.lane.b32.xlu0 %v669_v5, %s2046_s10  ;;  %v944_v4 = vstv %s1788_s28  ;;  %v931_v5 = vrot.slane %v925_v59, 1  ;;  %s2414_s28 = sld [smem:[#allocation2 + $0x39]] }
  0x8c   : > { %v947_v14 = vmul.f32 %v2308_v22, %v944_v4 }
  0x8d   : > { %v934_v18 = vsel %vm332_vm0, %v931_v5, %v933_v7 }
  0x8e   : > { %v954_v23 = vrot.slane %v947_v14, 1 }
  0x8f   : > { %711 = vrot.lane.b32.xlu1 %v706_v9, %s2045_s4  ;;  %709 = vrot.lane.b32.xlu0 %v705_v10, %s2045_s4  ;;  %v930_v9 = vrot.slane %v924_v62, 1  ;;  %v946_v10 = vmul.f32 %v2286_v6, %v944_v4  ;;  %v223_v62 = vstv %s2374_s9  ;;  %s2492_s9 = sld [smem:[#allocation2 + $0x21]] }
  0x93   : > { %725 = vrot.lane.b32.xlu1 %v720_v12, %s2045_s4  ;;  %723 = vrot.lane.b32.xlu0 %v719_v13, %s2045_s4  ;;  %v913_v12 = vsel %vm332_vm0, %v910_v63, %v912_v2  ;;  %v911_v13 = vsel %vm332_vm0, %v909_v3, %v910_v63  ;;  %v1087_v63 = vrot.slane %v1081_v49, 2  ;;  %v1089_v2 = vrot.slane %v1082_v50, 2 }
  0x94   : > { %v215_v3 = vstv %s2377_s11  ;;  %s2505_s11 = sld [smem:[#allocation2 + $0x2f]] }
  0x95   : > { %v1090_v21 = vsel %vm510_vm1, %v1087_v63, %v1089_v2 }
  0x97   : > { %739 = vrot.lane.b32.xlu1 %v734_v16, %s2045_s4  ;;  %737 = vrot.lane.b32.xlu0 %v733_v17, %s2045_s4  ;;  %v945_v16 = vmul.f32 %v2289_v8, %v944_v4  ;;  %v1018_v17 = vmul.f32 %v2286_v6, %v1016_v11 }
  0x99   : > { %v1024_v27 = vrot.slane %v1018_v17, 2  ;;  %v1121_v17 = vstv %s2391_s19  ;;  %s2523_s19 = sld [smem:[#allocation2 + $0x4a]] }
  0x9a   : > { %v1124_v29 = vmul.f32 %v2308_v22, %v1121_v17  ;;  %v1122_v30 = vmul.f32 %v2289_v8, %v1121_v17 }
  0x9b   : > { %753 = vrot.lane.b32.xlu1 %v748_v19, %s2046_s10  ;;  %751 = vrot.lane.b32.xlu0 %v747_v20, %s2046_s10  ;;  %v932_v19 = vsel %vm332_vm0, %v930_v9, %v931_v5  ;;  %v952_v20 = vrot.slane %v946_v10, 1  ;;  %v1027_v43 = vsel %vm510_vm1, %v1024_v27, %v1026_v28  ;;  %v1123_v28 = vmul.f32 %v2286_v6, %v1121_v17  ;;  %v2488_v17 = vld [vmem:[%s2168_s30 + $0x30] sm:$0xff] }
  0x9c   : > { %v1131_v49 = vrot.slane %v1124_v29, 2  ;;  %v1128_v50 = vrot.slane %v1122_v30, 2 }
  0x9f   : > { %767 = vrot.lane.b32.xlu1 %v762_v24, %s2046_s10  ;;  %765 = vrot.lane.b32.xlu0 %v761_v25, %s2046_s10  ;;  %v951_v24 = vrot.slane %v945_v16, 1  ;;  %v1017_v25 = vmul.f32 %v2289_v8, %v1016_v11  ;;  %v1086_v11 = vrot.slane %v1080_v57, 2 }
  0xa1   : > { %v953_v33 = vsel %vm332_vm0, %v951_v24, %v952_v20  ;;  %v1023_v34 = vrot.slane %v1017_v25, 2 }
  0xa3   : > { %781 = vrot.lane.b32.xlu1 %v776_v31, %s2046_s10  ;;  %779 = vrot.lane.b32.xlu0 %v775_v32, %s2046_s10  ;;  %v1058_v31 = vstv %s1794_s5  ;;  %v955_v32 = vsel %vm332_vm0, %v952_v20, %v954_v23  ;;  %v1025_v44 = vsel %vm510_vm1, %v1023_v34, %v1024_v27  ;;  %v235_v20 = vstv %s2393_s21  ;;  %s2466_s5 = sld [smem:[#allocation2 + $0x2e]]  ;;  %s2530_s21 = sld [smem:[#allocation2 + $0x3c]] }
  0xa4   : > { %v1060_v38 = vmul.f32 %v2286_v6, %v1058_v31  ;;  %v1061_v41 = vmul.f32 %v2308_v22, %v1058_v31  ;;  %v1088_v27 = vsel %vm510_vm1, %v1086_v11, %v1087_v63 }
  0xa6   : > { %v1066_v53 = vrot.slane %v1060_v38, 2  ;;  %v343_v38 = vstv %s2410_s26  ;;  %s2553_s26 = sld [smem:[#allocation2 + $0x4c]] }
  0xa7   : > { %853 = vrot.lane.b32.xlu1 %v850_v45, %s2045_s4  ;;  %851 = vrot.lane.b32.xlu0 %v848_v46, %s2045_s4  ;;  %v1044_v45 = vrot.slane %v1038_v35, 2  ;;  %v1059_v46 = vmul.f32 %v2289_v8, %v1058_v31  ;;  %v344_v63 = vmul.f32 %v343_v38, %v2171_v0 }
  0xa9   : > { %v1046_v55 = vsel %vm510_vm1, %v1044_v45, %v1045_v39  ;;  %v1065_v56 = vrot.slane %v1059_v46, 2  ;;  %v236_v39 = vmul.f32 %v235_v20, %v2171_v0  ;;  %v326_v45 = vmul.f32 %v325_v26, %v2171_v0 }
  0xaa   : > { %v1129_v46 = vrot.slane %v1123_v28, 2 }
  0xab   : > { %874 = vrot.lane.b32.xlu1 %v871_v51, %s2045_s4  ;;  %872 = vrot.lane.b32.xlu0 %v869_v54, %s2045_s4  ;;  %v229_v51 = vstv %s2361_s7  ;;  %v1068_v54 = vrot.slane %v1061_v41, 2  ;;  %v1067_v10 = vsel %vm510_vm1, %v1065_v56, %v1066_v53  ;;  %v328_v41 = vmul.f32 %v325_v26, %v2191_v15  ;;  %s2483_s7 = sld [smem:[#allocation2 + $0x6]] }
  0xac   : > { %v230_v61 = vmul.f32 %v229_v51, %v2171_v0  ;;  %v1130_v11 = vsel %vm510_vm1, %v1128_v50, %v1129_v46 }
  0xad   : > { %v1069_v9 = vsel %vm510_vm1, %v1066_v53, %v1068_v54  ;;  %v346_v54 = vmul.f32 %v343_v38, %v2191_v15 }
  0xaf   : > { %895 = vrot.lane.b32.xlu1 %v892_v58, %s2045_s4  ;;  %893 = vrot.lane.b32.xlu0 %v890_v60, %s2045_s4  ;;  %v1100_v58 = vstv %s2368_s8  ;;  %s2490_s8 = sld [smem:[#allocation2 + $0x14]] }
  0xb0   : > { %v1102_v4 = vmul.f32 %v2286_v6, %v1100_v58  ;;  %v1103_v5 = vmul.f32 %v2308_v22, %v1100_v58  ;;  %v1101_v7 = vmul.f32 %v2289_v8, %v1100_v58  ;;  %v360_v22 = vstv %s2414_s28  ;;  %s2568_s28 = sld [smem:[#allocation2 + $0x17]] }
  0xb1   : > { %v363_v56 = vmul.f32 %v360_v22, %v2191_v15  ;;  %v361_v57 = vmul.f32 %v360_v22, %v2171_v0 }
  0xb2   : > { %v1108_v23 = vrot.slane %v1102_v4, 2  ;;  %v1110_v24 = vrot.slane %v1103_v5, 2  ;;  %v1107_v25 = vrot.slane %v1101_v7, 2  ;;  %v334_v4 = vrot.slane %v2456_v40, 1  ;;  %v2480_v7 = vld [vmem:[%s2168_s30 + $0x38] sm:$0xff] }
  0xb3   : > { %916 = vrot.lane.b32.xlu1 %v913_v12, %s2046_s10  ;;  %914 = vrot.lane.b32.xlu0 %v911_v13, %s2046_s10  ;;  %v213_v12 = vstv %s2385_s18  ;;  %v224_v13 = vmul.f32 %v223_v62, %v2171_v0  ;;  %v336_v5 = vrot.slane %v328_v41, 1  ;;  %v1193_v40 = vstv %s2469_s6  ;;  %s2511_s18 = sld [smem:[#allocation2 + $0x16]]  ;;  %s2602_s6 = sld [smem:[#allocation2 + $0x9]] }
  0xb5   : > { %v226_v31 = vadd.f32 %v224_v13, %v213_v12 }
  0xb7   : > { %937 = vrot.lane.b32.xlu1 %v934_v18, %s2046_s10  ;;  %935 = vrot.lane.b32.xlu0 %v932_v19, %s2046_s10  ;;  %v2433_v18 = vadd.f32 %v230_v61, %v215_v3  ;;  %v231_v19 = vmul.f32 %v229_v51, %v2174_v1  ;;  %v345_v51 = vmul.f32 %v343_v38, %v2174_v1 }
  0xb9   : > { %v2370_v36 = vpop.permute.xlu1 %260  ;;  %v2372_v37 = vpop.permute.xlu0 %246  ;;  %v233_v58 = vadd.f32 %v231_v19, %v215_v3  ;;  %v1132_v3 = vsel %vm510_vm1, %v1129_v46, %v1131_v49  ;;  %v351_v13 = vrot.slane %v345_v51, 1  ;;  %v1194_v46 = vmul.f32 %v2488_v17, %v1193_v40 }
  0xba   : > { %v252_v29 = vadd.f32 %v2372_v37, %v226_v31  ;;  %v503_v49 = vstv %s2483_s7  ;;  %v266_v50 = vadd.f32 %v2370_v36, %v2433_v18  ;;  %s2607_s7 = sld [smem:[#allocation2 + $0x24]] }
  0xbb   : > { %958 = vrot.lane.b32.xlu1 %v955_v32, %s2046_s10  ;;  %956 = vrot.lane.b32.xlu0 %v953_v33, %s2046_s10  ;;  %v225_v32 = vmul.f32 %v223_v62, %v2174_v1  ;;  %v237_v33 = vmul.f32 %v235_v20, %v2174_v1  ;;  %v238_v62 = vadd.f32 %v236_v39, %v217_v42  ;;  %v353_v20 = vrot.slane %v346_v54, 1 }
  0xbc   : > { %v505_v36 = vmul.f32 %v503_v49, %v2174_v1  ;;  %v504_v18 = vmul.f32 %v503_v49, %v2171_v0 }
  0xbd   : > { %v2387_v47 = vpop.permute.xlu1 %262  ;;  %v2389_v48 = vpop.permute.xlu0 %248  ;;  %v239_v61 = vadd.f32 %v237_v33, %v217_v42  ;;  %v227_v2 = vadd.f32 %v225_v32, %v213_v12  ;;  %v1179_v33 = vstv %s2466_s5  ;;  %s2595_s5 = sld [smem:[#allocation2 + $0x19]] }
  0xbe   : > { %v267_v51 = vadd.f32 %v2387_v47, %v233_v58  ;;  %v506_v47 = vmul.f32 %v503_v49, %v2191_v15 }
  0xbf   : > { %1030 = vrot.lane.b32.xlu1 %v1027_v43, %s2045_s4  ;;  %1028 = vrot.lane.b32.xlu0 %v1025_v44, %s2045_s4  ;;  %v1111_v43 = vsel %vm510_vm1, %v1108_v23, %v1110_v24  ;;  %v1109_v44 = vsel %vm510_vm1, %v1107_v25, %v1108_v23  ;;  %v370_v23 = vrot.slane %v363_v56, 1  ;;  %v367_v24 = vrot.slane %v361_v57, 1 }
  0xc0   : > { %v253_v30 = vadd.f32 %v2389_v48, %v227_v2 }
  0xc1   : > { %v2406_v59 = vpop.permute.xlu1 %276  ;;  %v2408_v60 = vpop.permute.xlu0 %274 }
  0xc2   : > { %v281_v25 = vadd.f32 %v2406_v59, %v239_v61  ;;  %v280_v26 = vadd.f32 %v2408_v60, %v238_v62  ;;  %v337_v59 = vsel %vm332_vm0, %v334_v4, %v336_v5  ;;  %v1207_v61 = vstv %s2490_s8  ;;  %s2614_s8 = sld [smem:[#allocation2 + $0x34]] }
  0xc3   : > { %1051 = vrot.lane.b32.xlu1 %v1048_v52, %s2045_s4  ;;  %1049 = vrot.lane.b32.xlu0 %v1046_v55, %s2045_s4  ;;  %v362_v55 = vmul.f32 %v360_v22, %v2174_v1  ;;  %v521_v62 = vstv %s2492_s9  ;;  %s2620_s9 = sld [smem:[#allocation2 + $0x3f]] }
  0xc5   : > { %v2428_v14 = vpop.permute.xlu1 %290  ;;  %v2430_v16 = vpop.permute.xlu0 %288 }
  0xc6   : > { %v295_v60 = vadd.f32 %v2428_v14, %v253_v30  ;;  %v294_v37 = vadd.f32 %v2430_v16, %v252_v29  ;;  %v1180_v14 = vmul.f32 %v2488_v17, %v1179_v33  ;;  %v1195_v16 = vmul.f32 %v2480_v7, %v1193_v40  ;;  %v1918_v30 = vld [vmem:[%s2168_s30] sm:$0xff] }
  0xc7   : > { %1072 = vrot.lane.b32.xlu1 %v1069_v9, %s2045_s4  ;;  %1070 = vrot.lane.b32.xlu0 %v1067_v10, %s2045_s4  ;;  %v1165_v9 = vstv %s2441_s27  ;;  %v333_v10 = vrot.slane %v326_v45, 1  ;;  %v1181_v45 = vmul.f32 %v2480_v7, %v1179_v33  ;;  %s2586_s27 = sld [smem:[#allocation2 + $0x4d]] }
  0xc8   : > { %v1167_v28 = vmul.f32 %v2480_v7, %v1165_v9  ;;  %v1166_v32 = vmul.f32 %v2488_v17, %v1165_v9  ;;  %v341_v54 = vadd.f32 %v337_v59, %v295_v60 }
  0xc9   : > { %v2449_v34 = vpop.permute.xlu1 %304  ;;  %v2451_v35 = vpop.permute.xlu0 %302  ;;  %v335_v42 = vsel %vm332_vm0, %v333_v10, %v334_v4  ;;  %v1221_v10 = vstv %s2505_s11  ;;  %s2630_s11 = sld [smem:[#allocation2 + $0x4f]] }
  0xca   : > { %v308_v2 = vadd.f32 %v2451_v35, %v266_v50  ;;  %v1223_v59 = vmul.f32 %v2480_v7, %v1221_v10  ;;  %v1222_v40 = vmul.f32 %v2488_v17, %v1221_v10 }
  0xcb   : > { %1093 = vrot.lane.b32.xlu1 %v1090_v21, %s2046_s10  ;;  %1091 = vrot.lane.b32.xlu0 %v1088_v27, %s2046_s10  ;;  %v368_v21 = vrot.slane %v362_v55, 1  ;;  %v350_v27 = vrot.slane %v344_v63, 1  ;;  %v340_v55 = vadd.f32 %v335_v42, %v294_v37  ;;  %v309_v63 = vadd.f32 %v2449_v34, %v267_v51 }
  0xcc   : > { %v1209_v34 = vmul.f32 %v2480_v7, %v1207_v61  ;;  %v538_v37 = vstv %s2530_s21  ;;  %s2658_s21 = sld [smem:[#allocation2 + $0xc]] }
  0xcd   : > { %v319_v52 = vpop.permute.xlu1 %318  ;;  %v317_v53 = vpop.permute.xlu0 %316  ;;  %v371_v41 = vsel %vm332_vm0, %v368_v21, %v370_v23  ;;  %v369_v22 = vsel %vm332_vm0, %v367_v24, %v368_v21  ;;  %v1300_v21 = vstv %s2511_s18  ;;  %v2548_v24 = vld [vmem:[%s2168_s30 + $0x40] sm:$0x3]  ;;  %s2635_s18 = sld [smem:[#allocation2 + $0x1a]] }
  0xce   : > { %v323_v38 = vadd.f32 %v319_v52, %v281_v25  ;;  %v322_v39 = vadd.f32 %v317_v53, %v280_v26  ;;  %v512_v25 = vrot.slane %v505_v36, 2  ;;  %v514_v26 = vrot.slane %v506_v47, 2 }
  0xcf   : > { %1114 = vrot.lane.b32.xlu1 %v1111_v43, %s2046_s10  ;;  %1112 = vrot.lane.b32.xlu0 %v1109_v44, %s2046_s10  ;;  %v354_v43 = vsel %vm332_vm0, %v351_v13, %v353_v20  ;;  %v352_v44 = vsel %vm332_vm0, %v350_v27, %v351_v13  ;;  %v523_v13 = vmul.f32 %v521_v62, %v2174_v1  ;;  %v511_v27 = vrot.slane %v504_v18, 2 }
  0xd0   : > { %v375_v52 = vadd.f32 %v371_v41, %v323_v38  ;;  %v374_v53 = vadd.f32 %v369_v22, %v322_v39  ;;  %v524_v20 = vmul.f32 %v521_v62, %v2191_v15  ;;  %v358_v0 = vadd.f32 %v354_v43, %v309_v63 }
  0xd1   : > { %v392_v12 = vpop.permute.xlu1 %391  ;;  %v390_v19 = vpop.permute.xlu0 %389  ;;  %v357_v23 = vadd.f32 %v352_v44, %v308_v2  ;;  %v1302_v33 = vmul.f32 %v2480_v7, %v1300_v21  ;;  %v1303_v60 = vmul.f32 %v2548_v24, %v1300_v21  ;;  %v529_v42 = vrot.slane %v523_v13, 2 }
  0xd2   : > { %v396_v58 = vadd.f32 %v392_v12, %v341_v54  ;;  %v395_v9 = vadd.f32 %v390_v19, %v340_v55  ;;  %v1301_v44 = vmul.f32 %v2488_v17, %v1300_v21  ;;  %v541_v54 = vmul.f32 %v538_v37, %v2191_v15 }
  0xd3   : > { %1135 = vrot.lane.b32.xlu1 %v1132_v3, %s2046_s10  ;;  %1133 = vrot.lane.b32.xlu0 %v1130_v11, %s2046_s10  ;;  %v1208_v11 = vmul.f32 %v2488_v17, %v1207_v61  ;;  %v1310_v51 = vrot.slane %v1303_v60, 1  ;;  %v539_v55 = vmul.f32 %v1918_v30, %v538_v37  ;;  %v1342_v47 = vstv %s2553_s26  ;;  %s2674_s26 = sld [smem:[#allocation2 + $0x27]] }
  0xd4   : > { %v1307_v63 = vrot.slane %v1301_v44, 1  ;;  %v1345_v21 = vmul.f32 %v2548_v24, %v1342_v47 }
  0xd5   : > { %v413_v48 = vpop.permute.xlu1 %412  ;;  %v411_v31 = vpop.permute.xlu0 %410 }
  0xd6   : > { %v417_v1 = vadd.f32 %v413_v48, %v358_v0  ;;  %v416_v29 = vadd.f32 %v411_v31, %v357_v23  ;;  %v531_v48 = vrot.slane %v524_v20, 2  ;;  %v515_v31 = vsel %vm510_vm1, %v512_v25, %v514_v26 }
  0xd7   : > { %1172 = vrot.lane.b32.xlu1 %v1167_v28, %s2045_s4  ;;  %1170 = vrot.lane.b32.xlu0 %v1166_v32, %s2045_s4  ;;  %v1235_v28 = vstv %s2523_s19  ;;  %v522_v32 = vmul.f32 %v1918_v30, %v521_v62  ;;  %v1344_v20 = vmul.f32 %v2480_v7, %v1342_v47  ;;  %s2650_s19 = sld [smem:[#allocation2 + $0x35]] }
  0xd8   : > { %v1237_v43 = vmul.f32 %v2480_v7, %v1235_v28  ;;  %v1236_v61 = vmul.f32 %v2488_v17, %v1235_v28  ;;  %v532_v62 = vsel %vm510_vm1, %v529_v42, %v531_v48  ;;  %v1363_v28 = vstv %s2568_s28  ;;  %s2686_s28 = sld [smem:[#allocation2 + $0x42]] }
  0xd9   : > { %v434_v56 = vpop.permute.xlu1 %433  ;;  %v432_v57 = vpop.permute.xlu0 %431 }
  0xda   : > { %v438_v4 = vadd.f32 %v434_v56, %v375_v52  ;;  %v437_v5 = vadd.f32 %v432_v57, %v374_v53  ;;  %v1919_v52 = vld [vmem:[%s2168_s30 + $0x8] sm:$0xff] }
  0xdb   : > { %1186 = vrot.lane.b32.xlu1 %v1181_v45, %s2045_s4  ;;  %1184 = vrot.lane.b32.xlu0 %v1180_v14, %s2045_s4  ;;  %v513_v45 = vsel %vm510_vm1, %v511_v27, %v512_v25  ;;  %v528_v14 = vrot.slane %v522_v32, 2  ;;  %v540_v53 = vmul.f32 %v1919_v52, %v538_v37  ;;  %v1365_v37 = vmul.f32 %v2480_v7, %v1363_v28 }
  0xdd   : > { %v455_v35 = vpop.permute.xlu1 %454  ;;  %v453_v3 = vpop.permute.xlu0 %452  ;;  %v530_v15 = vsel %vm510_vm1, %v528_v14, %v529_v42  ;;  %v546_v10 = vrot.slane %v540_v53, 2 }
  0xde   : > { %v459_v12 = vadd.f32 %v455_v35, %v396_v58  ;;  %v458_v19 = vadd.f32 %v453_v3, %v395_v9  ;;  %v548_v35 = vrot.slane %v541_v54, 2  ;;  %v545_v3 = vrot.slane %v539_v55, 2 }
  0xdf   : > { %1200 = vrot.lane.b32.xlu1 %v1195_v16, %s2045_s4  ;;  %1198 = vrot.lane.b32.xlu0 %v1194_v46, %s2045_s4  ;;  %v1308_v16 = vrot.slane %v1302_v33, 1  ;;  %v1321_v46 = vstv %s2541_s23  ;;  %s2670_s23 = sld [smem:[#allocation2 + $0x50]] }
  0xe0   : > { %v1323_v2 = vmul.f32 %v2480_v7, %v1321_v46  ;;  %v1324_v36 = vmul.f32 %v2548_v24, %v1321_v46  ;;  %v519_v18 = vadd.f32 %v515_v31, %v459_v12  ;;  %v518_v58 = vadd.f32 %v513_v45, %v458_v19 }
  0xe1   : > { %v476_v38 = vpop.permute.xlu1 %475  ;;  %v474_v39 = vpop.permute.xlu0 %473  ;;  %v1309_v0 = vsel %vm332_vm0, %v1307_v63, %v1308_v16  ;;  %v1343_v19 = vmul.f32 %v2488_v17, %v1342_v47  ;;  %v549_v30 = vsel %vm510_vm1, %v546_v10, %v548_v35  ;;  %v547_v32 = vsel %vm510_vm1, %v545_v3, %v546_v10 }
  0xe2   : > { %v480_v41 = vadd.f32 %v476_v38, %v417_v1  ;;  %v479_v22 = vadd.f32 %v474_v39, %v416_v29  ;;  %v1329_v23 = vrot.slane %v1323_v2, 1  ;;  %v1331_v12 = vrot.slane %v1324_v36, 1 }
  0xe3   : > { %1214 = vrot.lane.b32.xlu1 %v1209_v34, %s2046_s10  ;;  %1212 = vrot.lane.b32.xlu0 %v1208_v11, %s2046_s10  ;;  %v1311_v34 = vsel %vm332_vm0, %v1308_v16, %v1310_v51  ;;  %v1350_v39 = vrot.slane %v1344_v20, 1  ;;  %v1349_v60 = vrot.slane %v1343_v19, 1  ;;  %v1364_v31 = vmul.f32 %v2488_v17, %v1363_v28 }
  0xe4   : > { %v536_v25 = vadd.f32 %v532_v62, %v480_v41  ;;  %v535_v26 = vadd.f32 %v530_v15, %v479_v22  ;;  %v1366_v41 = vmul.f32 %v2548_v24, %v1363_v28  ;;  %v1384_v45 = vstv %s2582_s29  ;;  %s1790_s29 = sld [smem:[#allocation2 + $0x2a]] }
  0xe5   : > { %v497_v49 = vpop.permute.xlu1 %496  ;;  %v495_v50 = vpop.permute.xlu0 %494  ;;  %v1371_v51 = vrot.slane %v1365_v37, 1  ;;  %v1370_v53 = vrot.slane %v1364_v31, 1  ;;  %v1386_v54 = vmul.f32 %v2480_v7, %v1384_v45  ;;  %v1387_v55 = vmul.f32 %v2548_v24, %v1384_v45 }
  0xe6   : > { %v501_v56 = vadd.f32 %v497_v49, %v438_v4  ;;  %v500_v57 = vadd.f32 %v495_v50, %v437_v5  ;;  %v1322_v4 = vmul.f32 %v2488_v17, %v1321_v46  ;;  %v1405_v46 = vstv %s2586_s27  ;;  %s1791_s27 = sld [smem:[#allocation2 + $0x45]] }
  0xe7   : > { %1228 = vrot.lane.b32.xlu1 %v1223_v59, %s2046_s10  ;;  %1226 = vrot.lane.b32.xlu0 %v1222_v40, %s2046_s10  ;;  %v1352_v59 = vrot.slane %v1345_v21, 1  ;;  %v1332_v40 = vsel %vm332_vm0, %v1329_v23, %v1331_v12  ;;  %v1351_v50 = vsel %vm332_vm0, %v1349_v60, %v1350_v39  ;;  %v1373_v52 = vrot.slane %v1366_v41, 1 }
  0xe8   : > { %v1328_v27 = vrot.slane %v1322_v4, 1  ;;  %v553_v22 = vadd.f32 %v549_v30, %v501_v56  ;;  %v552_v42 = vadd.f32 %v547_v32, %v500_v57  ;;  %v1385_v56 = vmul.f32 %v2488_v17, %v1384_v45 }
  0xe9   : > { %v570_v5 = vpop.permute.xlu1 %569  ;;  %v568_v9 = vpop.permute.xlu0 %567  ;;  %v1353_v49 = vsel %vm332_vm0, %v1350_v39, %v1352_v59  ;;  %v1407_v62 = vmul.f32 %v2480_v7, %v1405_v46  ;;  %v1408_v36 = vmul.f32 %v2548_v24, %v1405_v46  ;;  %v1477_v47 = vstv %s2595_s5  ;;  %s1801_s5 = sld [smem:[#allocation2 + $0x12]] }
  0xea   : > { %v574_v11 = vadd.f32 %v570_v5, %v519_v18  ;;  %v573_v13 = vadd.f32 %v568_v9, %v518_v58  ;;  %v1330_v48 = vsel %vm332_vm0, %v1328_v27, %v1329_v23  ;;  %v1374_v18 = vsel %vm332_vm0, %v1371_v51, %v1373_v52 }
  0xeb   : > { %1242 = vrot.lane.b32.xlu1 %v1237_v43, %s2046_s10  ;;  %1240 = vrot.lane.b32.xlu0 %v1236_v61, %s2046_s10  ;;  %v686_v58 = vstv %s2602_s6  ;;  %v1406_v15 = vmul.f32 %v2488_v17, %v1405_v46  ;;  %v1372_v4 = vsel %vm332_vm0, %v1370_v53, %v1371_v51  ;;  %v1392_v5 = vrot.slane %v1386_v54, 1  ;;  %s1802_s6 = sld [smem:[#allocation2 + $0x2d]] }
  0xec   : > { %v1394_v9 = vrot.slane %v1387_v55, 1  ;;  %v692_v3 = vstv %s2607_s7  ;;  %v1415_v23 = vrot.slane %v1408_v36, 1  ;;  %v688_v12 = vmul.f32 %v2286_v6, %v686_v58  ;;  %s2799_s7 = sld [smem:[#allocation2 + $0x48]] }
  0xed   : > { %v591_v1 = vpop.permute.xlu1 %590  ;;  %v589_v29 = vpop.permute.xlu0 %588  ;;  %v687_v19 = vmul.f32 %v2289_v8, %v686_v58  ;;  %v698_v59 = vstv %s2620_s9  ;;  %v1519_v45 = vstv %s2630_s11  ;;  %v1540_v54 = vstv %s2635_s18  ;;  %s1812_s9 = sld [smem:[#allocation2 + $0x4b]]  ;;  %s1819_s11 = sld [smem:[#allocation2 + $0x18]] }
  0xee   : > { %v595_v33 = vadd.f32 %v591_v1, %v536_v25  ;;  %v594_v38 = vadd.f32 %v589_v29, %v535_v26  ;;  %v1412_v25 = vrot.slane %v1406_v15, 1  ;;  %v1498_v26 = vstv %s2614_s8  ;;  %s1811_s8 = sld [smem:[#allocation2 + $0x30]]  ;;  %s2815_s18 = sld [smem:[#allocation2 + $0x33]] }
  0xef   : > { %1314 = vrot.lane.b32.xlu1 %v1311_v34, %s2045_s4  ;;  %1312 = vrot.lane.b32.xlu0 %v1309_v0, %s2045_s4  ;;  %v1391_v34 = vrot.slane %v1385_v56, 1  ;;  %v1413_v0 = vrot.slane %v1407_v62, 1  ;;  %v1395_v27 = vsel %vm332_vm0, %v1392_v5, %v1394_v9  ;;  %v694_v1 = vmul.f32 %v2286_v6, %v692_v3 }
  0xf0   : > { %v1478_v29 = vmul.f32 %v2488_v17, %v1477_v47  ;;  %v1500_v41 = vmul.f32 %v2480_v7, %v1498_v26 }
  0xf1   : > { %v612_v43 = vpop.permute.xlu1 %611  ;;  %v610_v44 = vpop.permute.xlu0 %609  ;;  %v1393_v28 = vsel %vm332_vm0, %v1391_v34, %v1392_v5  ;;  %v1416_v37 = vsel %vm332_vm0, %v1413_v0, %v1415_v23  ;;  %v1561_v5 = vstv %s2650_s19  ;;  %s2849_s19 = sld [smem:[#allocation2 + $0x4e]] }
  0xf2   : > { %v616_v14 = vadd.f32 %v612_v43, %v553_v22  ;;  %v615_v16 = vadd.f32 %v610_v44, %v552_v42  ;;  %v1414_v22 = vsel %vm332_vm0, %v1412_v25, %v1413_v0  ;;  %v1501_v42 = vmul.f32 %v2548_v24, %v1498_v26 }
  0xf3   : > { %1335 = vrot.lane.b32.xlu1 %v1332_v40, %s2045_s4  ;;  %1333 = vrot.lane.b32.xlu0 %v1330_v48, %s2045_s4  ;;  %v1499_v48 = vmul.f32 %v2488_v17, %v1498_v26  ;;  %v1484_v44 = vrot.slane %v1478_v29, 2  ;;  %v1506_v53 = vrot.slane %v1500_v41, 2  ;;  %v1564_v25 = vmul.f32 %v2548_v24, %v1561_v5  ;;  %v2691_v29 = vld [vmem:[%s2168_s30 + $0x20] sm:$0xff] }
  0xf4   : > { %v1508_v55 = vrot.slane %v1501_v42, 2 }
  0xf5   : > { %v633_v57 = vpop.permute.xlu1 %632  ;;  %v631_v61 = vpop.permute.xlu0 %630  ;;  %v1505_v56 = vrot.slane %v1499_v48, 2  ;;  %v1571_v48 = vrot.slane %v1564_v25, 2 }
  0xf6   : > { %v637_v63 = vadd.f32 %v633_v57, %v574_v11  ;;  %v636_v2 = vadd.f32 %v631_v61, %v573_v13  ;;  %v1479_v11 = vmul.f32 %v2480_v7, %v1477_v47  ;;  %v1480_v13 = vmul.f32 %v2548_v24, %v1477_v47 }
  0xf7   : > { %1356 = vrot.lane.b32.xlu1 %v1353_v49, %s2045_s4  ;;  %1354 = vrot.lane.b32.xlu0 %v1351_v50, %s2045_s4  ;;  %v700_v49 = vmul.f32 %v2286_v6, %v698_v59  ;;  %v699_v50 = vmul.f32 %v2289_v8, %v698_v59  ;;  %v1521_v57 = vmul.f32 %v2480_v7, %v1519_v45  ;;  %v2701_v59 = vld [vmem:[%s2168_s30 + $0x18] sm:$0xff] }
  0xf8   : > { %v1487_v39 = vrot.slane %v1480_v13, 2  ;;  %v690_v31 = vadd.f32 %v688_v12, %v637_v63  ;;  %v689_v43 = vadd.f32 %v687_v19, %v636_v2  ;;  %v1522_v61 = vmul.f32 %v2548_v24, %v1519_v45 }
  0xf9   : > { %v654_v10 = vpop.permute.xlu1 %653  ;;  %v652_v35 = vpop.permute.xlu0 %651  ;;  %v1542_v47 = vmul.f32 %v2480_v7, %v1540_v54  ;;  %v1509_v9 = vsel %vm510_vm1, %v1506_v53, %v1508_v55  ;;  %v1507_v34 = vsel %vm510_vm1, %v1505_v56, %v1506_v53  ;;  %v1563_v19 = vmul.f32 %v2480_v7, %v1561_v5 }
  0xfa   : > { %v658_v20 = vadd.f32 %v654_v10, %v595_v33  ;;  %v657_v21 = vadd.f32 %v652_v35, %v594_v38  ;;  %v693_v33 = vmul.f32 %v2289_v8, %v692_v3  ;;  %v1485_v38 = vrot.slane %v1479_v11, 2 }
  0xfb   : > { %1377 = vrot.lane.b32.xlu1 %v1374_v18, %s2046_s10  ;;  %1375 = vrot.lane.b32.xlu0 %v1372_v4, %s2046_s10  ;;  %v1520_v8 = vmul.f32 %v2488_v17, %v1519_v45  ;;  %v1543_v18 = vmul.f32 %v2548_v24, %v1540_v54  ;;  %v1541_v4 = vmul.f32 %v2488_v17, %v1540_v54  ;;  %v1527_v10 = vrot.slane %v1521_v57, 2 }
  0xfc   : > { %v1488_v46 = vsel %vm510_vm1, %v1485_v38, %v1487_v39  ;;  %v696_v62 = vadd.f32 %v694_v1, %v658_v20  ;;  %v695_v63 = vadd.f32 %v693_v33, %v657_v21  ;;  %v1486_v6 = vsel %vm510_vm1, %v1484_v44, %v1485_v38 }
  0xfd   : > { %v675_v30 = vpop.permute.xlu1 %674  ;;  %v673_v32 = vpop.permute.xlu0 %672  ;;  %v1529_v35 = vrot.slane %v1522_v61, 2  ;;  %v1526_v13 = vrot.slane %v1520_v8, 2  ;;  %v788_v20 = vstv %s2658_s21  ;;  %v1548_v23 = vrot.slane %v1542_v47, 2 }
  0xfe   : > { %v679_v40 = vadd.f32 %v675_v30, %v616_v14  ;;  %v678_v60 = vadd.f32 %v673_v32, %v615_v16  ;;  %v1550_v12 = vrot.slane %v1543_v18, 2  ;;  %v1562_v1 = vmul.f32 %v2488_v17, %v1561_v5  ;;  %v2695_v32 = vld [vmem:[%s2168_s30 + $0x28] sm:$0x3] }
  0xff   : > { %1398 = vrot.lane.b32.xlu1 %v1395_v27, %s2046_s10  ;;  %1396 = vrot.lane.b32.xlu0 %v1393_v28, %s2046_s10  ;;  %v1547_v28 = vrot.slane %v1541_v4, 2  ;;  %v790_v30 = vmul.f32 %v2691_v29, %v788_v20  ;;  %v791_v33 = vmul.f32 %v2695_v32, %v788_v20  ;;  %v1530_v38 = vsel %vm510_vm1, %v1527_v10, %v1529_v35 }
 0x100   : > { %v702_v3 = vadd.f32 %v700_v49, %v679_v40  ;;  %v701_v11 = vadd.f32 %v699_v50, %v678_v60  ;;  %v1528_v39 = vsel %vm510_vm1, %v1526_v13, %v1527_v10  ;;  %v789_v40 = vmul.f32 %v2701_v59, %v788_v20 }
 0x101   : > { %v712_v14 = vpop.permute.xlu1 %711  ;;  %v710_v16 = vpop.permute.xlu0 %709  ;;  %v1582_v60 = vstv %s2670_s23  ;;  %v1569_v42 = vrot.slane %v1563_v19, 2  ;;  %v1549_v45 = vsel %vm510_vm1, %v1547_v28, %v1548_v23 }
 0x102   : > { %v716_v51 = vadd.f32 %v712_v14, %v690_v31  ;;  %v715_v52 = vadd.f32 %v710_v16, %v689_v43  ;;  %v805_v31 = vstv %s2674_s26  ;;  %v1568_v14 = vrot.slane %v1562_v1, 2  ;;  %s1837_s26 = smul.u32 768, %s2033_s15 }
 0x103   : > { %1419 = vrot.lane.b32.xlu1 %v1416_v37, %s2046_s10  ;;  %1417 = vrot.lane.b32.xlu0 %v1414_v22, %s2046_s10  ;;  %v1551_v22 = vsel %vm510_vm1, %v1548_v23, %v1550_v12  ;;  %v796_v16 = vrot.slane %v790_v30, 1  ;;  %v1584_v49 = vmul.f32 %v2480_v7, %v1582_v60  ;;  %v1585_v50 = vmul.f32 %v2548_v24, %v1582_v60 }
 0x104   : > { %v795_v53 = vrot.slane %v789_v40, 1  ;;  %v1583_v54 = vmul.f32 %v2488_v17, %v1582_v60  ;;  %v806_v57 = vmul.f32 %v2701_v59, %v805_v31  ;;  %v1570_v8 = vsel %vm510_vm1, %v1568_v14, %v1569_v42 }
 0x105   : > { %v726_v2 = vpop.permute.xlu1 %725  ;;  %v724_v36 = vpop.permute.xlu0 %723  ;;  %v1592_v47 = vrot.slane %v1585_v50, 2 }
 0x106   : > { %v730_v58 = vadd.f32 %v726_v2, %v696_v62  ;;  %v729_v15 = vadd.f32 %v724_v36, %v695_v63  ;;  %v1572_v63 = vsel %vm510_vm1, %v1569_v42, %v1571_v48  ;;  %v1590_v36 = vrot.slane %v1584_v49, 2 }
 0x107   : > { %1491 = vrot.lane.b32.xlu1 %v1488_v46, %s2045_s4  ;;  %1489 = vrot.lane.b32.xlu0 %v1486_v6, %s2045_s4  ;;  %v798_v46 = vrot.slane %v791_v33, 1  ;;  %v822_v6 = vstv %s2686_s28  ;;  %v797_v18 = vsel %vm332_vm0, %v795_v53, %v796_v16  ;;  %v1589_v4 = vrot.slane %v1583_v54, 2 }
 0x108   : > { %v824_v10 = vmul.f32 %v2691_v29, %v822_v6  ;;  %v825_v35 = vmul.f32 %v2695_v32, %v822_v6  ;;  %v1593_v20 = vsel %vm510_vm1, %v1590_v36, %v1592_v47 }
 0x109   : > { %v740_v21 = vpop.permute.xlu1 %739  ;;  %v738_v0 = vpop.permute.xlu0 %737  ;;  %v799_v2 = vsel %vm332_vm0, %v796_v16, %v798_v46  ;;  %v1591_v23 = vsel %vm510_vm1, %v1589_v4, %v1590_v36 }
 0x10a   : > { %v744_v26 = vadd.f32 %v740_v21, %v702_v3  ;;  %v743_v27 = vadd.f32 %v738_v0, %v701_v11  ;;  %v823_v3 = vmul.f32 %v2701_v59, %v822_v6  ;;  %v830_v1 = vrot.slane %v824_v10, 1 }
 0x10b   : > { %1512 = vrot.lane.b32.xlu1 %v1509_v9, %s2045_s4  ;;  %1510 = vrot.lane.b32.xlu0 %v1507_v34, %s2045_s4  ;;  %v812_v34 = vrot.slane %v806_v57, 1  ;;  %v832_v30 = vrot.slane %v825_v35, 1 }
 0x10d   : > { %v754_v37 = vpop.permute.xlu1 %753  ;;  %v752_v41 = vpop.permute.xlu0 %751 }
 0x10e   : > { %v758_v43 = vadd.f32 %v754_v37, %v716_v51  ;;  %v757_v44 = vadd.f32 %v752_v41, %v715_v52  ;;  %v807_v51 = vmul.f32 %v2691_v29, %v805_v31  ;;  %v808_v52 = vmul.f32 %v2695_v32, %v805_v31 }
 0x10f   : > { %1533 = vrot.lane.b32.xlu1 %v1530_v38, %s2045_s4  ;;  %1531 = vrot.lane.b32.xlu0 %v1528_v39, %s2045_s4  ;;  %s1789_s4 = sld [smem:[#allocation2 + $0xf]]  ;;  %v833_v37 = vsel %vm332_vm0, %v830_v1, %v832_v30 }
 0x110   : > { %v813_v5 = vrot.slane %v807_v51, 1  ;;  %v815_v9 = vrot.slane %v808_v52, 1  ;;  %v803_v21 = vadd.f32 %v799_v2, %v758_v43  ;;  %v802_v0 = vadd.f32 %v797_v18, %v757_v44 }
 0x111   : > { %v768_v55 = vpop.permute.xlu1 %767  ;;  %v766_v56 = vpop.permute.xlu0 %765 }
 0x112   : > { %v772_v61 = vadd.f32 %v768_v55, %v730_v58  ;;  %v771_v62 = vadd.f32 %v766_v56, %v729_v15  ;;  %v816_v12 = vsel %vm332_vm0, %v813_v5, %v815_v9  ;;  %v814_v28 = vsel %vm332_vm0, %v812_v34, %v813_v5 }
 0x113   : > { %1554 = vrot.lane.b32.xlu1 %v1551_v22, %s2046_s10  ;;  %1552 = vrot.lane.b32.xlu0 %v1549_v45, %s2046_s10  ;;  %v982_v55 = vstv %s1790_s29 }
 0x114   : > { %v820_v38 = vadd.f32 %v816_v12, %v772_v61  ;;  %v819_v39 = vadd.f32 %v814_v28, %v771_v62  ;;  %v999_v61 = vstv %s1791_s27  ;;  %v985_v2 = vmul.f32 %v2695_v32, %v982_v55  ;;  %s2911_s27 = scalar_lea.hbm %s2968_s3, %s1837_s26 }
 0x115   : > { %v782_v58 = vpop.permute.xlu1 %781  ;;  %v780_v15 = vpop.permute.xlu0 %779  ;;  %v965_v45 = vstv %s1789_s4  ;;  %v983_v36 = vmul.f32 %v2701_v59, %v982_v55  ;;  %v1001_v5 = vmul.f32 %v2691_v29, %v999_v61  ;;  %v1002_v9 = vmul.f32 %v2695_v32, %v999_v61 }
 0x116   : > { %v786_v11 = vadd.f32 %v782_v58, %v744_v26  ;;  %v785_v13 = vadd.f32 %v780_v15, %v743_v27  ;;  %v829_v26 = vrot.slane %v823_v3, 1  ;;  %v967_v46 = vmul.f32 %v2691_v29, %v965_v45 }
 0x117   : > { %1575 = vrot.lane.b32.xlu1 %v1572_v63, %s2046_s10  ;;  %1573 = vrot.lane.b32.xlu0 %v1570_v8, %s2046_s10  ;;  %v968_v49 = vmul.f32 %v2695_v32, %v965_v45  ;;  %v966_v54 = vmul.f32 %v2701_v59, %v965_v45  ;;  %v984_v8 = vmul.f32 %v2691_v29, %v982_v55  ;;  %v992_v3 = vrot.slane %v985_v2, 2 }
 0x118   : > { %v831_v41 = vsel %vm332_vm0, %v829_v26, %v830_v1  ;;  %v837_v48 = vadd.f32 %v833_v37, %v786_v11  ;;  %v973_v56 = vrot.slane %v967_v46, 2  ;;  %v1000_v58 = vmul.f32 %v2701_v59, %v999_v61 }
 0x119   : > { %v854_v19 = vpop.permute.xlu1 %853  ;;  %v852_v25 = vpop.permute.xlu0 %851  ;;  %v836_v31 = vadd.f32 %v831_v41, %v785_v13  ;;  %v975_v57 = vrot.slane %v968_v49, 2  ;;  %v972_v6 = vrot.slane %v966_v54, 2  ;;  %v990_v35 = vrot.slane %v984_v8, 2 }
 0x11a   : > { %v858_v27 = vadd.f32 %v854_v19, %v803_v21  ;;  %v857_v33 = vadd.f32 %v852_v25, %v802_v0  ;;  %v989_v11 = vrot.slane %v983_v36, 2  ;;  %v1009_v25 = vrot.slane %v1002_v9, 2 }
 0x11b   : > { %1596 = vrot.lane.b32.xlu1 %v1593_v20, %s2046_s10  ;;  %1594 = vrot.lane.b32.xlu0 %v1591_v23, %s2046_s10  ;;  %v976_v4 = vsel %vm510_vm1, %v973_v56, %v975_v57  ;;  %v974_v10 = vsel %vm510_vm1, %v972_v6, %v973_v56  ;;  %v1007_v23 = vrot.slane %v1001_v5, 2  ;;  %v993_v29 = vsel %vm510_vm1, %v990_v35, %v992_v3  ;;  %s1810_s10 = sld [smem:[#allocation2 + $0x15]] }
 0x11c   : > { %v991_v32 = vsel %vm510_vm1, %v989_v11, %v990_v35  ;;  %v1006_v59 = vrot.slane %v1000_v58, 2  ;;  %v1266_v11 = vstv %s1811_s8 }
 0x11d   : > { %v875_v40 = vpop.permute.xlu1 %874  ;;  %v873_v60 = vpop.permute.xlu0 %872 }
 0x11e   : > { %v879_v22 = vadd.f32 %v875_v40, %v820_v38  ;;  %v878_v42 = vadd.f32 %v873_v60, %v819_v39  ;;  %v1010_v38 = vsel %vm510_vm1, %v1007_v23, %v1009_v25  ;;  %v1008_v39 = vsel %vm510_vm1, %v1006_v59, %v1007_v23 }
 0x11f   : > { %v1426_v25 = vstv %s1819_s11 }
 0x121   : > { %v896_v43 = vpop.permute.xlu1 %895  ;;  %v894_v44 = vpop.permute.xlu0 %893  ;;  %v1249_v2 = vstv %s1810_s10 }
 0x122   : > { %v900_v14 = vadd.f32 %v896_v43, %v837_v48  ;;  %v899_v16 = vadd.f32 %v894_v44, %v836_v31  ;;  %v1252_v5 = vmul.f32 %v2548_v24, %v1249_v2  ;;  %v1250_v9 = vmul.f32 %v2488_v17, %v1249_v2 }
 0x125   : > { %v917_v50 = vpop.permute.xlu1 %916  ;;  %v915_v53 = vpop.permute.xlu0 %914 }
 0x126   : > { %v921_v51 = vadd.f32 %v917_v50, %v858_v27  ;;  %v920_v52 = vadd.f32 %v915_v53, %v857_v33 }
 0x128   : > { %v980_v21 = vadd.f32 %v976_v4, %v921_v51  ;;  %v979_v0 = vadd.f32 %v974_v10, %v920_v52  ;;  %v1251_v4 = vmul.f32 %v2480_v7, %v1249_v2  ;;  %v1159_v10 = vstv %s2799_s7 }
 0x129   : > { %v938_v62 = vpop.permute.xlu1 %937  ;;  %v936_v63 = vpop.permute.xlu0 %935 }
 0x12a   : > { %v942_v47 = vadd.f32 %v938_v62, %v879_v22  ;;  %v941_v18 = vadd.f32 %v936_v63, %v878_v42 }
 0x12c   : > { %v997_v30 = vadd.f32 %v993_v29, %v942_v47  ;;  %v996_v26 = vadd.f32 %v991_v32, %v941_v18  ;;  %v1147_v18 = vstv %s1801_s5  ;;  %s2047_s5 = smov [#allocation7]  }
 0x12d   : > { %v959_v15 = vpop.permute.xlu1 %958  ;;  %v957_v34 = vpop.permute.xlu0 %956  ;;  %v1149_v35 = vmul.f32 %v2480_v7, %v1147_v18  ;;  %v1148_v3 = vmul.f32 %v2488_v17, %v1147_v18  ;;  %v1429_v18 = vmul.f32 %v2548_v24, %v1426_v25 }
 0x12e   : > { %v963_v13 = vadd.f32 %v959_v15, %v900_v14  ;;  %v962_v20 = vadd.f32 %v957_v34, %v899_v16  ;;  %v1153_v34 = vstv %s1802_s6  ;;  %s1959_s6 = sshll.u32 %s2047_s5, 4  ;;  %s1960_s6 = int_to_ptr.vmem [resolvable:$false] %s1959_s6 }
 0x12f   : > { %v1155_v23 = vmul.f32 %v2480_v7, %v1153_v34  ;;  %s1961_s7 = scalar_lea.vmem %s1960_s6, 1536 }
 0x130   : > { %v1014_v37 = vadd.f32 %v1010_v38, %v963_v13  ;;  %v1013_v41 = vadd.f32 %v1008_v39, %v962_v20  ;;  %v1257_v13 = vrot.slane %v1251_v4, 1  ;;  %v1259_v20 = vrot.slane %v1252_v5, 1 }
 0x131   : > { %v1031_v12 = vpop.permute.xlu1 %1030  ;;  %v1029_v19 = vpop.permute.xlu0 %1028  ;;  %v1427_v4 = vmul.f32 %v2488_v17, %v1426_v25 }
 0x132   : > { %v2749_v28 = vadd.f32 %v1031_v12, %v980_v21  ;;  %v2751_v1 = vadd.f32 %v1029_v19, %v979_v0  ;;  %v1256_v21 = vrot.slane %v1250_v9, 1  ;;  %v1283_v0 = vstv %s1812_s9 }
 0x133   : > { %v1154_v12 = vmul.f32 %v2488_v17, %v1153_v34  ;;  %v1161_v19 = vmul.f32 %v2480_v7, %v1159_v10  ;;  %v1285_v38 = vmul.f32 %v2480_v7, %v1283_v0  ;;  %v1286_v39 = vmul.f32 %v2548_v24, %v1283_v0 }
 0x135   : > { %v1052_v27 = vpop.permute.xlu1 %1051  ;;  %v1050_v33 = vpop.permute.xlu0 %1049 }
 0x136   : > { %v2755_v40 = vadd.f32 %v1052_v27, %v997_v30  ;;  %v2757_v60 = vadd.f32 %v1050_v33, %v996_v26  ;;  %v1268_v26 = vmul.f32 %v2480_v7, %v1266_v11  ;;  %v1269_v27 = vmul.f32 %v2548_v24, %v1266_v11 }
 0x137   : > { %v1267_v33 = vmul.f32 %v2488_v17, %v1266_v11 }
 0x138   : > { %v1274_v34 = vrot.slane %v1268_v26, 1 }
 0x139   : > { %v1073_v22 = vpop.permute.xlu1 %1072  ;;  %v1071_v42 = vpop.permute.xlu0 %1070  ;;  %v1273_v11 = vrot.slane %v1267_v33, 1  ;;  %v1924_v33 = vld [vmem:[%s2168_s30 + $0x30] sm:$0xff] }
 0x13a   : > { %v2759_v48 = vadd.f32 %v1073_v22, %v1014_v37  ;;  %v2761_v31 = vadd.f32 %v1071_v42, %v1013_v41  ;;  %v1284_v37 = vmul.f32 %v2488_v17, %v1283_v0  ;;  %v1160_v41 = vmul.f32 %v2488_v17, %v1159_v10  ;;  %v2836_v42 = vld [vmem:[%s2168_s30 + $0x38] sm:$0xff]  ;;  %s202_s30 = sand.u32 1, %s2025_s13  }
 0x13b   : > { %v1260_v22 = vsel %vm332_vm0, %v1257_v13, %v1259_v20  ;;  %v1276_v10 = vrot.slane %v1269_v27, 1  ;;  %s1835_s21 = smul.u32 48, %s202_s30  ;;  %s2919_s15 = scalar_lea.sflag [#allocation3], %s202_s30 }
 0x13d   : > { %v1094_v43 = vpop.permute.xlu1 %1093  ;;  %v1092_v44 = vpop.permute.xlu0 %1091  ;;  %v1277_v27 = vsel %vm332_vm0, %v1274_v34, %v1276_v10  ;;  %s204_s23 = scalar_lea.vmem [#allocation7], %s1835_s21 }
 0x13e   : > { %v1098_v59 = vadd.f32 %v1094_v43, %v2749_v28  ;;  %v1097_v30 = vadd.f32 %v1092_v44, %v2751_v1  ;;  %v1258_v28 = vsel %vm332_vm0, %v1256_v21, %v1257_v13  ;;  %v1428_v1 = vmul.f32 %v2836_v42, %v1426_v25  ;;  %s1627_s28 = sshll.u32 %s204_s23, 4  ;;  %s2913_s28 = int_to_ptr.vmem [resolvable:$true] %s1627_s28 }
 0x13f   : > { %v1290_v13 = vrot.slane %v1284_v37, 1  ;;  %v1443_v21 = vstv %s2815_s18  ;;  %s1955_s10 = scalar_lea.vmem %s2913_s28, 768  ;;  %p1962_p1 = scmp.lt.s32.totalorder %s2913_s28, %s1960_s6 }
 0x140   : > { %v1151_v5 = vadd.f32 %v1149_v35, %v1098_v59  ;;  %v1150_v9 = vadd.f32 %v1148_v3, %v1097_v30  ;;  %v1434_v20 = vrot.slane %v1428_v1, 2  ;;  %v1436_v35 = vrot.slane %v1429_v18, 2  ;;  %p1956_p8 = scmp.ne.s32.totalorder %s2913_s28, %s1955_s10  ;;  %p1963_p6 = scmp.lt.s32.totalorder %s1961_s7, %s1955_s10 }
 0x141   : > { %v2763_v45 = vpop.permute.xlu1 %1114  ;;  %v2765_v14 = vpop.permute.xlu0 %1112  ;;  %v1433_v3 = vrot.slane %v1427_v4, 2  ;;  %v1445_v30 = vmul.f32 %v2836_v42, %v1443_v21  ;;  %v1446_v26 = vmul.f32 %v2548_v24, %v1443_v21 }
 0x142   : > { %v1119_v43 = vadd.f32 %v2763_v45, %v2755_v40  ;;  %v1118_v7 = vadd.f32 %v2765_v14, %v2757_v60  ;;  %v1291_v40 = vrot.slane %v1285_v38, 1  ;;  %v1293_v45 = vrot.slane %v1286_v39, 1  ;;  %p1957_p11 = pnand %p1956_p8, %p2984_p10  ;;  %p1964_p7 = por %p1963_p6, %p1962_p1 }
 0x143   : > { %v1451_v18 = vrot.slane %v1445_v30, 2  ;;  %v1453_v4 = vrot.slane %v1446_v26, 2 }
 0x144   : > { %v1157_v0 = vadd.f32 %v1155_v23, %v1119_v43  ;;  %v1437_v43 = vsel %vm510_vm1, %v1434_v20, %v1436_v35  ;;  %p1958_p13 = pneg %p1957_p11 }
 0x145   : > { %v2767_v16 = vpop.permute.xlu1 %1135  ;;  %v2769_v46 = vpop.permute.xlu0 %1133 }
 0x146   : > { %v1140_v25 = vadd.f32 %v2767_v16, %v2759_v48  ;;  %v1139_v59 = vadd.f32 %v2769_v46, %v2761_v31  ;;  %v1275_v48 = vsel %vm332_vm0, %v1273_v11, %v1274_v34  ;;  %v1294_v16 = vsel %vm332_vm0, %v1291_v40, %v1293_v45  ;;  %p1965_p9 = pnand %p1964_p7, %p1958_p13 }
 0x147   : > { %v1292_v31 = vsel %vm332_vm0, %v1290_v13, %v1291_v40 }
 0x148   : > { %v1163_v38 = vadd.f32 %v1161_v19, %v1140_v25  ;;  %v1162_v39 = vadd.f32 %v1160_v41, %v1139_v59 }
 0x149   : > { %v2771_v49 = vpop.permute.xlu1 %1172  ;;  %v2773_v50 = vpop.permute.xlu0 %1170 }
 0x14a   : > { %v1177_v60 = vadd.f32 %v2771_v49, %v1151_v5  ;;  %v1176_v14 = vadd.f32 %v2773_v50, %v1150_v9 }
 0x14d   : > { %v2775_v53 = vpop.permute.xlu1 %1186  ;;  %v2777_v54 = vpop.permute.xlu0 %1184 }
 0x14e   : > { %v1191_v23 = vadd.f32 %v2775_v53, %v1157_v0 }
 0x151   : > { %v2779_v51 = vpop.permute.xlu1 %1200  ;;  %v2781_v52 = vpop.permute.xlu0 %1198 }
 0x155   : > { %v2783_v55 = vpop.permute.xlu1 %1214  ;;  %v2785_v56 = vpop.permute.xlu0 %1212 }
 0x156   : > { %v1219_v49 = vadd.f32 %v2783_v55, %v1177_v60  ;;  %v1218_v50 = vadd.f32 %v2785_v56, %v1176_v14 }
 0x158   : > { %v1264_v37 = vadd.f32 %v1260_v22, %v1219_v49  ;;  %v1263_v1 = vadd.f32 %v1258_v28, %v1218_v50 }
 0x159   : > { %v2787_v57 = vpop.permute.xlu1 %1228  ;;  %v2789_v61 = vpop.permute.xlu0 %1226 }
 0x15a   : > { %v1233_v46 = vadd.f32 %v2787_v57, %v1191_v23  ;;  %v1205_v57 = vadd.f32 %v2779_v51, %v1163_v38 }
 0x15c   : > { %v1281_v34 = vadd.f32 %v1277_v27, %v1233_v46 }
 0x15d   : > { %v2791_v62 = vpop.permute.xlu1 %1242  ;;  %v2793_v63 = vpop.permute.xlu0 %1240 }
 0x15e   : > { %v1247_v11 = vadd.f32 %v2791_v62, %v1205_v57  ;;  %v1454_v62 = vsel %vm510_vm1, %v1451_v18, %v1453_v4 }
 0x161   : > { %v2795_v6 = vpop.permute.xlu1 %1314  ;;  %v2797_v8 = vpop.permute.xlu0 %1312 }
 0x162   : > { %v1319_v5 = vadd.f32 %v2795_v6, %v1264_v37  ;;  %v1318_v9 = vadd.f32 %v2797_v8, %v1263_v1 }
 0x165   : > { %v2801_v36 = vpop.permute.xlu1 %1335  ;;  %v2803_v47 = vpop.permute.xlu0 %1333 }
 0x166   : > { %v1340_v6 = vadd.f32 %v2801_v36, %v1281_v34 }
 0x169   : > { %v2808_v58 = vpop.permute.xlu1 %1356  ;;  %v2810_v15 = vpop.permute.xlu0 %1354 }
 0x16a   : > { %2980 = vst [vmem:[#allocation11_spill] sm:$0xff] %v2808_v58  ;;  %2981 = vst [vmem:[#allocation12_spill] sm:$0xff] %v2810_v15  ;;  %v1156_v15 = vadd.f32 %v1154_v12, %v1118_v7  ;;  %v1435_v7 = vsel %vm510_vm1, %v1433_v3, %v1434_v20 }
 0x16c   : > { %v1190_v12 = vadd.f32 %v2777_v54, %v1156_v15  ;;  %v1444_v54 = vmul.f32 %v1924_v33, %v1443_v21  ;;  %v1460_v15 = vstv %s2849_s19 }
 0x16d   : > { %v2820_v29 = vpop.permute.xlu1 %1377  ;;  %v2822_v32 = vpop.permute.xlu0 %1375  ;;  %v1462_v10 = vmul.f32 %v2836_v42, %v1460_v15  ;;  %v1463_v45 = vmul.f32 %v2548_v24, %v1460_v15  ;;  %v1461_v13 = vmul.f32 %v1924_v33, %v1460_v15 }
 0x16e   : > { %v1232_v55 = vadd.f32 %v2789_v61, %v1190_v12  ;;  %v1204_v61 = vadd.f32 %v2781_v52, %v1162_v39  ;;  %v1450_v22 = vrot.slane %v1444_v54, 2  ;;  %v1382_v51 = vadd.f32 %v2820_v29, %v1319_v5 }
 0x16f   : > { %v1381_v52 = vadd.f32 %v2822_v32, %v1318_v9  ;;  %v1298_v32 = vadd.f32 %v1294_v16, %v1247_v11  ;;  %v1470_v0 = vrot.slane %v1463_v45, 2  ;;  %v1467_v24 = vrot.slane %v1461_v13, 2 }
 0x170   : > { %v1280_v19 = vadd.f32 %v1275_v48, %v1232_v55  ;;  %v1246_v40 = vadd.f32 %v2793_v63, %v1204_v61  ;;  %v1452_v63 = vsel %vm510_vm1, %v1450_v22, %v1451_v18  ;;  %v1441_v36 = vadd.f32 %v1437_v43, %v1382_v51 }
 0x171   : > { %v2843_v44 = vpop.permute.xlu1 %1398  ;;  %v2845_v2 = vpop.permute.xlu0 %1396  ;;  %v1440_v21 = vadd.f32 %v1435_v7, %v1381_v52  ;;  %v2982_v35 = vld [vmem:[#allocation11_spill] sm:$0xff] }
 0x172   : > { %v1339_v8 = vadd.f32 %v2803_v47, %v1280_v19  ;;  %v1403_v60 = vadd.f32 %v2843_v44, %v1340_v6  ;;  %v1297_v20 = vadd.f32 %v1292_v31, %v1246_v40  ;;  %v1468_v47 = vrot.slane %v1462_v10, 2  ;;  %v2983_v44 = vld [vmem:[#allocation12_spill] sm:$0xff] }
 0x173   : > { %v1361_v3 = vadd.f32 %v2982_v35, %v1298_v32 }
 0x174   : > { %v1402_v42 = vadd.f32 %v2845_v2, %v1339_v8  ;;  %v1360_v25 = vadd.f32 %v2983_v44, %v1297_v20  ;;  %v1458_v49 = vadd.f32 %v1454_v62, %v1403_v60  ;;  %v1471_v16 = vsel %vm510_vm1, %v1468_v47, %v1470_v0 }
 0x175   : > { %v2854_v58 = vpop.permute.xlu1 %1419  ;;  %v2856_v17 = vpop.permute.xlu0 %1417  ;;  %v1469_v31 = vsel %vm510_vm1, %v1467_v24, %v1468_v47 }
 0x176   : > { %v1457_v50 = vadd.f32 %v1452_v63, %v1402_v42  ;;  %v1424_v30 = vadd.f32 %v2854_v58, %v1361_v3  ;;  %v1423_v26 = vadd.f32 %v2856_v17, %v1360_v25 }
 0x178   : > { %v1475_v33 = vadd.f32 %v1471_v16, %v1424_v30  ;;  %v1474_v58 = vadd.f32 %v1469_v31, %v1423_v26 }
 0x179   : > { %v1492_v56 = vpop.permute.xlu1 %1491  ;;  %v1490_v53 = vpop.permute.xlu0 %1489 }
 0x17a   : > { %v1496_v2 = vadd.f32 %v1492_v56, %v1441_v36  ;;  %v1495_v59 = vadd.f32 %v1490_v53, %v1440_v21 }
 0x17d   : > { %v1513_v41 = vpop.permute.xlu1 %1512  ;;  %v1511_v28 = vpop.permute.xlu0 %1510 }
 0x17e   : > { %v1517_v46 = vadd.f32 %v1513_v41, %v1458_v49  ;;  %v1516_v55 = vadd.f32 %v1511_v28, %v1457_v50 }
 0x181   : > { %v1534_v14 = vpop.permute.xlu1 %1533  ;;  %v1532_v29 = vpop.permute.xlu0 %1531 }
 0x182   : > { %v1538_v15 = vadd.f32 %v1534_v14, %v1475_v33  ;;  %v1537_v38 = vadd.f32 %v1532_v29, %v1474_v58 }
 0x185   : > { %v1555_v23 = vpop.permute.xlu1 %1554  ;;  %v1553_v12 = vpop.permute.xlu0 %1552 }
 0x186   : > { %v1559_v27 = vadd.f32 %v1555_v23, %v1496_v2  ;;  %v1558_v48 = vadd.f32 %v1553_v12, %v1495_v59 }
 0x188   : > { %1604 = vst.msk [vmem:[%s204_s23 + $0x8] sm:$0xff] %vm1602_vm2, %v1559_v27  ;;  %1603 = vst.msk [vmem:[%s204_s23] sm:$0xff] %vm1602_vm2, %v1558_v48 }
 0x189   : > { %v1576_v56 = vpop.permute.xlu1 %1575  ;;  %v1574_v53 = vpop.permute.xlu0 %1573 }
 0x18a   : > { %v1580_v17 = vadd.f32 %v1576_v56, %v1517_v46  ;;  %v1579_v54 = vadd.f32 %v1574_v53, %v1516_v55 }
 0x18c   : > { %1829 = vst.msk [vmem:[%s204_s23 + $0x18] sm:$0xff] %vm1602_vm2, %v1580_v17  ;;  %1828 = vst.msk [vmem:[%s204_s23 + $0x10] sm:$0xff] %vm1602_vm2, %v1579_v54 }
 0x18d   : > { %v1597_v39 = vpop.permute.xlu1 %1596  ;;  %v1595_v37 = vpop.permute.xlu0 %1594 }
 0x18e   : > { %v1601_v1 = vadd.f32 %v1597_v39, %v1538_v15  ;;  %v1600_v43 = vadd.f32 %v1595_v37, %v1537_v38 }
 0x190   : > { %1831 = vst.msk [vmem:[%s204_s23 + $0x28] sm:$0xff] %vm1602_vm2, %v1601_v1  ;;  %1830 = vst.msk [vmem:[%s204_s23 + $0x20] sm:$0xff] %vm1602_vm2, %v1600_v43 }
 0x191   : > { %1968 = shalt.err (!%p1965_p9)
}
 0x192   : > { %s1969_s8 = scalar_lea.hbm %s2911_s27, 768  ;;  %s1973_s18 = scalar_lea.hbm %s2968_s3, 1536 }
 0x193   : > { %p1970_p12 = scmp.ne.s32.totalorder %s2911_s27, %s1969_s8  ;;  %p1974_p3 = scmp.lt.u32.totalorder %s2911_s27, %s2968_s3 }
 0x194   : > { %p1975_p5 = scmp.lt.u32.totalorder %s1973_s18, %s1969_s8  ;;  %p1977_p8 = scmp.lt.u32.totalorder %s1969_s8, %s2911_s27 }
 0x195   : > { %p1971_p0 = pnand %p1970_p12, %p2984_p10 }
 0x196   : > { %p1976_p4 = por %p1975_p5, %p1974_p3 }
 0x197   : > { %p1972_p2 = pneg %p1971_p0 }
 0x198   : > { %p1978_p11 = por %p1977_p8, %p1976_p4 }
 0x19a   : > { %p1979_p13 = pnand %p1978_p11, %p1972_p2 }
 0x19c   : > { %1982 = shalt.err (!%p1979_p13)
}
 0x19d   : > { %s2048_s21 = smov 128   ;;  %s2049_s23 = smov 8  }
 0x19e   : > { %1846 = dma.vmem_to_hbm [thread:$0]  (%p2984_p10), %s2913_s28, 768, %s2911_s27, %s2919_s15, %s2048_s21, %s2048_s21, %s2049_s23  }
 0x19f PF: > { %p1863_p1 = scmp.ge.s32.totalorder %s2041_s17, 2  ;;  %s1642_s26 = sand.u32 1, %s2021_s12  }
 0x1a0   : > { %p2985_p6 = scmp.ne.s32.totalorder %s2974_s24, 0  ;;  %s1643_s4 = scalar_lea.sflag [#allocation3], %s1642_s26 }
 0x1a2   : > { %p1856_p7 = pnand %p1863_p1, %p2985_p6 }
 0x1a4   : > { %2016 = dma.done.wait (!%p1856_p7), %s1643_s4, 768  }
 0x1a5   : > { %2018 = vsyncadd (!%p1856_p7), %s1643_s4, 4294966528  ;;  %s18_s17 = sadd.s32 1, %s2041_s17   ;;  %s2986_s12 = smov %s2025_s13 }
 0x1a6   : > { %p15_p9 = scmp.ge.s32.totalorder %s18_s17, 4   ;;  %s2987_s13 = smov %s2029_s14 }
 0x1a7   : > { %s2988_s14 = smov %s2123_s25  ;;  %s2989_s15 = smov %s2037_s16 }
 0x1a8   : > { %s2990_s16 = smov %s2992_s20  ;;  %17 = sbr.rel (!%p15_p9) target bundleno = 6 (0x6), region = 81 }
 0x1af   :  { %1648 = vsyncpa [#allocation3], 1 }
 0x1b0   :  { %1650 = vsyncpa [#allocation3 + $0x1], 1 }
 0x1b1   :  { %1651 = vsyncpa [#allocation4], 1 }
 0x1b2   :  { %1653 = vsyncpa [#allocation4 + $0x1], 1 }
 0x1b3   :  { %1654 = vsyncpa [#allocation6], 1 }

</bundles_post_ra>
